<compile_context>
chip_gen: v7x
topology: tpu7x:2x2x1
jax: 0.10.0
libtpu: 0.0.40
codegen_flags: <defaults>
</compile_context>

<pallas_src>
import functools
import math

import numpy as np
import jax
import jax.numpy as jnp
from jax.experimental import pallas as pl
from jax.experimental.pallas import tpu as pltpu  # noqa: F401  (TPU backend)


# ---------------------------------------------------------------------------
# Fused kernel (single invocation, everything in VMEM):
#   q_ref, k_ref, v_ref : (N, T*E)       lane-dense activations
#   wq/wk/wv_ref        : (T*E, T*E)     kron(I_{T*H}, W^T) block-diagonal
#   wo_ref              : (T*E, T*E)     kron(I_T, Wo^T)    block-diagonal
#   bo_ref              : (1, T*E)       fc_out bias tiled over T
#   r_ref               : (T*E, T*H)     0/1 reduction matrix  R[(t,h,d),(t,h)]=1
#   rt_ref              : (T*H, T*E)     R^T (expansion matrix)
#   o_ref               : (N, T*E)       lane-dense output
# ---------------------------------------------------------------------------
def _sself_attention_kernel(q_ref, k_ref, v_ref, wq_ref, wk_ref, wv_ref,
                            wo_ref, bo_ref, r_ref, rt_ref, o_ref,
                            *, n_q, n_k, t_steps, heads, head_dim, scale):
    TH = t_steps * heads
    TE = TH * head_dim

    q = q_ref[...]                       # (Nq, T*E) f32
    k = k_ref[...]                       # (Nk, T*E)
    v = v_ref[...]                       # (Nk, T*E)

    # Per-head projections as single lane-dense matmuls against the
    # block-diagonal kron(I_{T*H}, W^T) weights (exact: off-block terms are 0).
    qp = jnp.dot(q, wq_ref[...], preferred_element_type=jnp.float32)   # (Nq, T*E)
    kp = jnp.dot(k, wk_ref[...], preferred_element_type=jnp.float32)   # (Nk, T*E)
    vp = jnp.dot(v, wv_ref[...], preferred_element_type=jnp.float32)   # (Nk, T*E)

    # energy[q, k, t, h] = sum_d qp[q, (t,h,d)] * kp[k, (t,h,d)]
    # = (elementwise outer product over node pairs) @ R   (one MXU op).
    p = qp[:, None, :] * kp[None, :, :]                                # (Nq, Nk, T*E)
    energy = jnp.dot(p.reshape(n_q * n_k, TE), r_ref[...],
                     preferred_element_type=jnp.float32)               # (Nq*Nk, T*H)
    energy = energy.reshape(n_q, n_k, TH)

    # TODO(synk): mask branch (energy * mask; energy[mask == 0] = 1e6) not
    # implemented -- this kernel covers the mask=None forward path.

    # softmax over the k (node) axis of clip(energy / sqrt(E), -5, 5)
    energy = jnp.clip(energy * scale, -5.0, 5.0)
    m = jnp.max(energy, axis=1, keepdims=True)                         # (Nq, 1, T*H)
    e = jnp.exp(energy - m)
    l = jnp.sum(e, axis=1, keepdims=True)
    attn = e / l                                                       # (Nq, Nk, T*H)

    # out[q, (t,h,d)] = sum_k attn[q, k, (t,h)] * vp[k, (t,h,d)]
    # attn is expanded across d with one matmul against R^T (exact 0/1 copy),
    # then multiplied by vp and reduced over the k (sublane) axis.
    attn_exp = jnp.dot(attn.reshape(n_q * n_k, TH), rt_ref[...],
                       preferred_element_type=jnp.float32)             # (Nq*Nk, T*E)
    ao = jnp.sum(attn_exp.reshape(n_q, n_k, TE) * vp[None, :, :], axis=1)  # (Nq, T*E)

    # fc_out fused: block-diagonal kron(I_T, Wo^T) + tiled bias; one unmasked
    # lane-dense store of the whole (Nq, T*E) block.
    out = jnp.dot(ao, wo_ref[...], preferred_element_type=jnp.float32) + bo_ref[...]
    o_ref[...] = out.astype(o_ref.dtype)


# ---------------------------------------------------------------------------
# Wrapper
# ---------------------------------------------------------------------------
@functools.partial(jax.jit, static_argnames=("heads",))
def sself_attention(values, keys, query, params, *, heads):
    """Pallas implementation of SSelfAttention.forward (mask=None)."""
    Wv, Wk, Wq, Wo, bo = params
    Nq, Tq, E = query.shape
    Nk, Tk, Ek = keys.shape
    assert Tq == Tk and Ek == E, "time / embed dims must match"
    assert E % heads == 0
    D = E // heads
    TH = Tq * heads
    TE = Tq * E
    scale = 1.0 / math.sqrt(float(E))

    # Natural lane-dense layouts: plain contiguous reshapes, NO transposes.
    q2 = query.reshape(Nq, TE)
    k2 = keys.reshape(Nk, TE)
    v2 = values.reshape(Nk, TE)

    # Block-diagonal weights (tiny, built once per call; weights are never
    # transposed or broadcast inside the kernel).
    eye_th = jnp.eye(TH, dtype=jnp.float32)
    eye_t = jnp.eye(Tq, dtype=jnp.float32)
    Wq_bd = jnp.kron(eye_th, Wq.T)            # (T*E, T*E)
    Wk_bd = jnp.kron(eye_th, Wk.T)
    Wv_bd = jnp.kron(eye_th, Wv.T)
    Wo_bd = jnp.kron(eye_t, Wo.T)             # (T*E, T*E)
    bo_t = jnp.tile(bo, Tq).reshape(1, TE)    # (1, T*E)

    # 0/1 reduction / expansion matrices (compile-time constants).
    R_np = np.kron(np.eye(TH, dtype=np.float32), np.ones((D, 1), np.float32))
    R = jnp.asarray(R_np)                     # (T*E, T*H)
    RT = jnp.asarray(R_np.T)                  # (T*H, T*E)

    out = pl.pallas_call(
        functools.partial(_sself_attention_kernel,
                          n_q=Nq, n_k=Nk, t_steps=Tq, heads=heads,
                          head_dim=D, scale=scale),
        out_shape=jax.ShapeDtypeStruct((Nq, TE), jnp.float32),
    )(q2, k2, v2, Wq_bd, Wk_bd, Wv_bd, Wo_bd, bo_t, R, RT)

    return out.reshape(Nq, Tq, E)


# ---------------------------------------------------------------------------
# Pure-JAX reference (mirrors the PyTorch forward, mask=None)
# ---------------------------------------------------------------------------
def sself_attention_ref(values, keys, query, params, *, heads):
    Wv, Wk, Wq, Wo, bo = params
    Nq, Tq, E = query.shape
    Nk, Tk, _ = keys.shape
    D = E // heads
    v = values.reshape(Nk, Tk, heads, D) @ Wv.T
    k = keys.reshape(Nk, Tk, heads, D) @ Wk.T
    q = query.reshape(Nq, Tq, heads, D) @ Wq.T
    energy = jnp.einsum('qthd,kthd->qkth', q, k)
    attn = jax.nn.softmax(jnp.clip(energy / jnp.sqrt(jnp.float32(E)), -5.0, 5.0),
                          axis=1)
    out = jnp.einsum('qkth,kthd->qthd', attn, v).reshape(Nq, Tq, E)
    return out @ Wo.T + bo


# ---------------------------------------------------------------------------
if __name__ == "__main__":
    # Small shapes consistent with the module: N nodes, T timesteps, E embed.
    N, T, E, H = 8, 8, 32, 4
    D = E // H

    key = jax.random.PRNGKey(0)
    k_in, k_wv, k_wk, k_wq, k_wo, k_bo = jax.random.split(key, 6)

    # inputs (values, keys, query) all (N, T, E)
    x_v = jax.random.normal(k_in, (3, N, T, E), dtype=jnp.float32)
    values, keys_in, query = x_v[0], x_v[1], x_v[2]

    # deterministic parameter init (PyTorch-style uniform(-1/sqrt(fan_in), ...))
    bd = 1.0 / math.sqrt(D)
    be = 1.0 / math.sqrt(E)
    Wv = jax.random.uniform(k_wv, (D, D), jnp.float32, -bd, bd)
    Wk = jax.random.uniform(k_wk, (D, D), jnp.float32, -bd, bd)
    Wq = jax.random.uniform(k_wq, (D, D), jnp.float32, -bd, bd)
    Wo = jax.random.uniform(k_wo, (E, E), jnp.float32, -be, be)
    bo = jax.random.uniform(k_bo, (E,), jnp.float32, -be, be)
    params = (Wv, Wk, Wq, Wo, bo)

    out = sself_attention(values, keys_in, query, params, heads=H)
    out = jax.block_until_ready(out)

    ref = sself_attention_ref(values, keys_in, query, params, heads=H)
    assert out.shape == (N, T, E)
    assert jnp.allclose(out, ref, atol=3e-4, rtol=3e-4), "mismatch vs reference"

    print("KERNEL_OK")
</pallas_src>

<mosaic_0001>
module attributes {stable_mosaic.version = 11 : i64} {
  func.func @_sself_attention_kernel(%arg0: memref<8x256xf32, #tpu.memory_space<vmem>>, %arg1: memref<8x256xf32, #tpu.memory_space<vmem>>, %arg2: memref<8x256xf32, #tpu.memory_space<vmem>>, %arg3: memref<256x256xf32, #tpu.memory_space<vmem>>, %arg4: memref<256x256xf32, #tpu.memory_space<vmem>>, %arg5: memref<256x256xf32, #tpu.memory_space<vmem>>, %arg6: memref<256x256xf32, #tpu.memory_space<vmem>>, %arg7: memref<1x256xf32, #tpu.memory_space<vmem>>, %arg8: memref<256x32xf32, #tpu.memory_space<vmem>>, %arg9: memref<32x256xf32, #tpu.memory_space<vmem>>, %arg10: memref<8x256xf32, #tpu.memory_space<vmem>>) attributes {dimension_semantics = [], scalar_prefetch = 0 : i64, scratch_operands = 0 : i64, tpu.core_type = #tpu.core_type<tc>} {
    %c0 = arith.constant 0 : index
    %c0_0 = arith.constant 0 : index
    %0 = vector.load %arg0[%c0, %c0_0] : memref<8x256xf32, #tpu.memory_space<vmem>>, vector<8x256xf32>
    %c0_1 = arith.constant 0 : index
    %c0_2 = arith.constant 0 : index
    %1 = vector.load %arg1[%c0_1, %c0_2] : memref<8x256xf32, #tpu.memory_space<vmem>>, vector<8x256xf32>
    %c0_3 = arith.constant 0 : index
    %c0_4 = arith.constant 0 : index
    %2 = vector.load %arg2[%c0_3, %c0_4] : memref<8x256xf32, #tpu.memory_space<vmem>>, vector<8x256xf32>
    %c0_5 = arith.constant 0 : index
    %c0_6 = arith.constant 0 : index
    %3 = vector.load %arg3[%c0_5, %c0_6] : memref<256x256xf32, #tpu.memory_space<vmem>>, vector<256x256xf32>
    %cst = arith.constant dense<0.000000e+00> : vector<8x256xf32>
    %4 = tpu.matmul %0, %3, %cst {dimension_numbers = #tpu.dot_dimension_numbers<[1], [0], [0], [1], [0, 0, 1, 1], [], []>} : vector<8x256xf32>, vector<256x256xf32>, vector<8x256xf32> -> vector<8x256xf32>
    %c0_7 = arith.constant 0 : index
    %c0_8 = arith.constant 0 : index
    %5 = vector.load %arg4[%c0_7, %c0_8] : memref<256x256xf32, #tpu.memory_space<vmem>>, vector<256x256xf32>
    %cst_9 = arith.constant dense<0.000000e+00> : vector<8x256xf32>
    %6 = tpu.matmul %1, %5, %cst_9 {dimension_numbers = #tpu.dot_dimension_numbers<[1], [0], [0], [1], [0, 0, 1, 1], [], []>} : vector<8x256xf32>, vector<256x256xf32>, vector<8x256xf32> -> vector<8x256xf32>
    %c0_10 = arith.constant 0 : index
    %c0_11 = arith.constant 0 : index
    %7 = vector.load %arg5[%c0_10, %c0_11] : memref<256x256xf32, #tpu.memory_space<vmem>>, vector<256x256xf32>
    %cst_12 = arith.constant dense<0.000000e+00> : vector<8x256xf32>
    %8 = tpu.matmul %2, %7, %cst_12 {dimension_numbers = #tpu.dot_dimension_numbers<[1], [0], [0], [1], [0, 0, 1, 1], [], []>} : vector<8x256xf32>, vector<256x256xf32>, vector<8x256xf32> -> vector<8x256xf32>
    %9 = vector.shape_cast %4 : vector<8x256xf32> to vector<8x1x256xf32>
    %10 = vector.shape_cast %6 : vector<8x256xf32> to vector<1x8x256xf32>
    %11 = vector.broadcast %9 : vector<8x1x256xf32> to vector<8x8x256xf32>
    %12 = vector.broadcast %10 : vector<1x8x256xf32> to vector<8x8x256xf32>
    %13 = arith.mulf %11, %12 : vector<8x8x256xf32>
    %14 = vector.shape_cast %13 : vector<8x8x256xf32> to vector<64x256xf32>
    %c0_13 = arith.constant 0 : index
    %c0_14 = arith.constant 0 : index
    %15 = vector.load %arg8[%c0_13, %c0_14] : memref<256x32xf32, #tpu.memory_space<vmem>>, vector<256x32xf32>
    %cst_15 = arith.constant dense<0.000000e+00> : vector<64x32xf32>
    %16 = tpu.matmul %14, %15, %cst_15 {dimension_numbers = #tpu.dot_dimension_numbers<[1], [0], [0], [1], [0, 0, 1, 1], [], []>} : vector<64x256xf32>, vector<256x32xf32>, vector<64x32xf32> -> vector<64x32xf32>
    %17 = vector.shape_cast %16 : vector<64x32xf32> to vector<8x8x32xf32>
    %cst_16 = arith.constant 0.176776692 : f32
    %18 = vector.broadcast %cst_16 : f32 to vector<8x8x32xf32>
    %19 = arith.mulf %17, %18 : vector<8x8x32xf32>
    %cst_17 = arith.constant -5.000000e+00 : f32
    %cst_18 = arith.constant 5.000000e+00 : f32
    %20 = vector.broadcast %cst_17 : f32 to vector<8x8x32xf32>
    %21 = arith.maximumf %20, %19 : vector<8x8x32xf32>
    %22 = vector.broadcast %cst_18 : f32 to vector<8x8x32xf32>
    %23 = arith.minimumf %22, %21 : vector<8x8x32xf32>
    %cst_19 = arith.constant dense<0xFF800000> : vector<8x32xf32>
    %24 = vector.multi_reduction <maximumf>, %23, %cst_19 [1] : vector<8x8x32xf32> to vector<8x32xf32>
    %25 = vector.shape_cast %24 : vector<8x32xf32> to vector<8x1x32xf32>
    %26 = vector.broadcast %25 : vector<8x1x32xf32> to vector<8x8x32xf32>
    %27 = arith.subf %23, %26 : vector<8x8x32xf32>
    %28 = math.exp %27 : vector<8x8x32xf32>
    %cst_20 = arith.constant dense<0.000000e+00> : vector<8x32xf32>
    %29 = vector.multi_reduction <add>, %28, %cst_20 [1] : vector<8x8x32xf32> to vector<8x32xf32>
    %30 = vector.shape_cast %29 : vector<8x32xf32> to vector<8x1x32xf32>
    %31 = vector.broadcast %30 : vector<8x1x32xf32> to vector<8x8x32xf32>
    %32 = arith.divf %28, %31 : vector<8x8x32xf32>
    %33 = vector.shape_cast %32 : vector<8x8x32xf32> to vector<64x32xf32>
    %c0_21 = arith.constant 0 : index
    %c0_22 = arith.constant 0 : index
    %34 = vector.load %arg9[%c0_21, %c0_22] : memref<32x256xf32, #tpu.memory_space<vmem>>, vector<32x256xf32>
    %cst_23 = arith.constant dense<0.000000e+00> : vector<64x256xf32>
    %35 = tpu.matmul %33, %34, %cst_23 {dimension_numbers = #tpu.dot_dimension_numbers<[1], [0], [0], [1], [0, 0, 1, 1], [], []>} : vector<64x32xf32>, vector<32x256xf32>, vector<64x256xf32> -> vector<64x256xf32>
    %36 = vector.shape_cast %35 : vector<64x256xf32> to vector<8x8x256xf32>
    %37 = vector.shape_cast %8 : vector<8x256xf32> to vector<1x8x256xf32>
    %38 = vector.broadcast %37 : vector<1x8x256xf32> to vector<8x8x256xf32>
    %39 = arith.mulf %36, %38 : vector<8x8x256xf32>
    %cst_24 = arith.constant dense<0.000000e+00> : vector<8x256xf32>
    %40 = vector.multi_reduction <add>, %39, %cst_24 [1] : vector<8x8x256xf32> to vector<8x256xf32>
    %c0_25 = arith.constant 0 : index
    %c0_26 = arith.constant 0 : index
    %41 = vector.load %arg6[%c0_25, %c0_26] : memref<256x256xf32, #tpu.memory_space<vmem>>, vector<256x256xf32>
    %cst_27 = arith.constant dense<0.000000e+00> : vector<8x256xf32>
    %42 = tpu.matmul %40, %41, %cst_27 {dimension_numbers = #tpu.dot_dimension_numbers<[1], [0], [0], [1], [0, 0, 1, 1], [], []>} : vector<8x256xf32>, vector<256x256xf32>, vector<8x256xf32> -> vector<8x256xf32>
    %c0_28 = arith.constant 0 : index
    %c0_29 = arith.constant 0 : index
    %43 = vector.load %arg7[%c0_28, %c0_29] : memref<1x256xf32, #tpu.memory_space<vmem>>, vector<1x256xf32>
    %44 = vector.broadcast %43 : vector<1x256xf32> to vector<8x256xf32>
    %45 = arith.addf %42, %44 : vector<8x256xf32>
    %c0_30 = arith.constant 0 : index
    %c0_31 = arith.constant 0 : index
    %46 = vector.load %arg10[%c0_30, %c0_31] : memref<8x256xf32, #tpu.memory_space<vmem>>, vector<8x256xf32>
    tpu.vector_store %arg10[%c0_30, %c0_31], %45 {strides = array<i32>} : memref<8x256xf32, #tpu.memory_space<vmem>>, vector<8x256xf32>,
    return
  }
}

</mosaic_0001>

<bundles_post_ra>
// kernel: tile.8
= control target key start
LH: loop header
LB: loop body
LE: loop exit
PB: predicated region body
PF: predicated region fallthrough
CT: control target
= control target key end

     0   :  { %s22_s0 = inlined_call_operand.vmem [shape: f32[32], index: 0, kind: input, shape index: {}]   ;;  %s23_s1 = inlined_call_operand.vmem [shape: f32[8,32], index: 1, kind: output, shape index: {}]  }
   0x1   :  { %v4_v0 = vld [vmem:[%s22_s0] ss:$0 sm:$0xff] }
   0x2   :  { %5 = vst [vmem:[%s23_s1] sm:$0xff] %v4_v0 }

// kernel: tile.9
= control target key start
LH: loop header
LB: loop body
LE: loop exit
PB: predicated region body
PF: predicated region fallthrough
CT: control target
= control target key end

     0   :  { %s7_s6 = smov 3  ;;  %s14_s9 = smov 3  ;;  %vm4_vm0 = vcmask 261120   ;;  %vm11_vm1 = vcmask 1048320   ;;  %vm18_vm2 = vcmask 785920   ;;  %vm25_vm3 = vcmask 523520   ;;  %s76_s0 = inlined_call_operand.vmem [shape: f32[8,32], index: 0, kind: input, shape index: {}]   ;;  %s77_s1 = inlined_call_operand.vmem [shape: f32[1,256], index: 1, kind: output, shape index: {}]  }
   0x1   :  { %v38_v0 = vld [vmem:[%s76_s0 + $0x3] ss:$4 sm:%s7_s6]   ;;  %s45_s10 = smov 96   ;;  %s21_s11 = smov 3  ;;  %v39_v1 = vld [vmem:[%s76_s0 + $0x2] ss:$4 sm:%s14_s9]  }
   0x2   :  { %9 = vrot.lane.b32.xlu0 %v38_v0, %s45_s10  ;;  %v40_v2 = vld [vmem:[%s76_s0 + $0x1] ss:$4 sm:%s21_s11]   ;;  %s2_s16 = smov 3  ;;  %s46_s17 = smov 32  }
   0x3   :  { %23 = vrot.lane.b32.xlu1 %v40_v2, %s46_s17  ;;  %v3_v3 = vld [vmem:[%s76_s0] ss:$4 sm:%s2_s16]   ;;  %s47_s0 = smov 64  }
   0x4   :  { %5 = vst.msk [vmem:[#allocation0] ss:$8 sm:$0x3] %vm4_vm0, %v3_v3  }
   0x6   :  { %16 = vrot.lane.b32.xlu0 %v39_v1, %s47_s0 }
  0x74   :  { %v10_v4 = vpop.permute.xlu0 %9  }
  0x75   :  { %12 = vst.msk [vmem:[#allocation0] ss:$8 sm:$0x3] %vm11_vm1, %v10_v4   ;;  %v24_v5 = vpop.permute.xlu1 %23  }
  0x78   :  { %v17_v6 = vpop.permute.xlu0 %16  }
  0x79   :  { %19 = vst.msk [vmem:[#allocation0] ss:$8 sm:$0x3] %vm18_vm2, %v17_v6  }
  0x7a   :  { %26 = vst.msk [vmem:[#allocation0] ss:$8 sm:$0x3] %vm25_vm3, %v24_v5  }
  0x81   :  { %v30_v7 = vld [vmem:[#allocation0] sm:$0x1]  ;;  %v34_v8 = vld [vmem:[#allocation0 + $0x8] sm:$0x1] }
  0x82   :  { %32 = vst [vmem:[%s77_s1] sm:$0x1] %v30_v7  ;;  %41 = vst [vmem:[%s77_s1 + $0x1] sm:$0x1] %v34_v8 }

// kernel: sself_attention.1
= control target key start
LH: loop header
LB: loop body
LE: loop exit
PB: predicated region body
PF: predicated region fallthrough
CT: control target
= control target key end

     0   :  { %vm755_vm0 = vcmask 261120   ;;  %vm1257_vm1 = vcmask 1041409   ;;  %vm1259_vm2 = vcmask 1042434   ;;  %vm1261_vm3 = vcmask 1043459   ;;  %s2838_s3 = inlined_call_operand.vmem [shape: f32[256,256], index: 3, kind: input, shape index: {}]   ;;  %s2839_s4 = inlined_call_operand.vmem [shape: f32[256,256], index: 4, kind: input, shape index: {}]   ;;  %s2840_s0 = inlined_call_operand.vmem [shape: f32[8,256], index: 0, kind: input, shape index: {}]   ;;  %s2841_s1 = inlined_call_operand.vmem [shape: f32[8,256], index: 1, kind: input, shape index: {}]   ;;  %s2842_s8 = inlined_call_operand.vmem [shape: f32[256,32], index: 8, kind: input, shape index: {}]   ;;  %s2843_s5 = inlined_call_operand.vmem [shape: f32[256,256], index: 5, kind: input, shape index: {}]   ;;  %s2844_s9 = inlined_call_operand.vmem [shape: f32[32,256], index: 9, kind: input, shape index: {}]   ;;  %s2845_s2 = inlined_call_operand.vmem [shape: f32[8,256], index: 2, kind: input, shape index: {}]   ;;  %s2846_s6 = inlined_call_operand.vmem [shape: f32[256,256], index: 6, kind: input, shape index: {}]   ;;  %s2847_s7 = inlined_call_operand.vmem [shape: f32[1,256], index: 7, kind: input, shape index: {}]   ;;  %s2848_s10 = inlined_call_operand.vmem [shape: f32[8,256], index: 10, kind: output, shape index: {}]  }
   0x1   :  { %v42_v0 = vld [vmem:[%s2838_s3 + $0x8] sm:$0xff]  ;;  %v44_v1 = vld [vmem:[%s2838_s3 + $0x18] sm:$0xff]  ;;  %v41_v2 = vld [vmem:[%s2838_s3] sm:$0xff]  ;;  %vm1263_vm4 = vcmask 1044484   ;;  %vm1265_vm5 = vcmask 1045509   ;;  %vm1267_vm6 = vcmask 1046534  }
   0x2   :  { %v1429_v3 = vpack.c.bf16 %v44_v1, %v42_v0  ;;  %v43_v4 = vld [vmem:[%s2838_s3 + $0x10] sm:$0xff]  ;;  %v46_v5 = vld [vmem:[%s2838_s3 + $0x28] sm:$0xff]  ;;  %v48_v6 = vld [vmem:[%s2838_s3 + $0x38] sm:$0xff]  ;;  %vm1269_vm7 = vcmask 1047559  }
   0x3   :  { %v1431_v7 = vpack.c.bf16 %v43_v4, %v41_v2  ;;  %v1433_v8 = vpack.c.bf16 %v48_v6, %v46_v5  ;;  %v45_v9 = vld [vmem:[%s2838_s3 + $0x20] sm:$0xff]  ;;  %v47_v10 = vld [vmem:[%s2838_s3 + $0x30] sm:$0xff]  ;;  %v177_v11 = vld [vmem:[%s2839_s4 + $0x8] sm:$0xff] }
   0x4   :  { %1430 = vmatprep.subr.bf16.mxu0 %v1429_v3  ;;  %v179_v12 = vld [vmem:[%s2839_s4 + $0x18] sm:$0xff]  ;;  %v50_v13 = vld [vmem:[%s2838_s3 + $0x48] sm:$0xff]  ;;  %v1435_v15 = vpack.c.bf16 %v47_v10, %v45_v9  ;;  %v176_v17 = vld [vmem:[%s2839_s4] sm:$0xff] }
   0x5   :  { %v52_v14 = vld [vmem:[%s2838_s3 + $0x58] sm:$0xff]  ;;  %1432 = vmatpush1.bf16.msra.mxu0 %v1431_v7  ;;  %v1493_v16 = vpack.c.bf16 %v179_v12, %v177_v11  ;;  %v178_v18 = vld [vmem:[%s2839_s4 + $0x10] sm:$0xff]  ;;  %v49_v19 = vld [vmem:[%s2838_s3 + $0x40] sm:$0xff] }
   0x6   :  { %1434 = vmatprep.subr.bf16.mxu0 %v1433_v8  ;;  %v1437_v20 = vpack.c.bf16 %v52_v14, %v50_v13  ;;  %v1495_v21 = vpack.c.bf16 %v178_v18, %v176_v17  ;;  %v51_v22 = vld [vmem:[%s2838_s3 + $0x50] sm:$0xff]  ;;  %v181_v23 = vld [vmem:[%s2839_s4 + $0x28] sm:$0xff]  ;;  %v183_v24 = vld [vmem:[%s2839_s4 + $0x38] sm:$0xff] }
   0x7   :  { %1494 = vmatprep.subr.bf16.mxu1 %v1493_v16  ;;  %v1497_v25 = vpack.c.bf16 %v183_v24, %v181_v23  ;;  %v54_v26 = vld [vmem:[%s2838_s3 + $0x68] sm:$0xff]  ;;  %v56_v27 = vld [vmem:[%s2838_s3 + $0x78] sm:$0xff]  ;;  %v180_v28 = vld [vmem:[%s2839_s4 + $0x20] sm:$0xff]  ;;  %v1439_v30 = vpack.c.bf16 %v51_v22, %v49_v19 }
   0x8   :  { %1496 = vmatpush1.bf16.msra.mxu1 %v1495_v21  ;;  %v182_v29 = vld [vmem:[%s2839_s4 + $0x30] sm:$0xff]  ;;  %v53_v32 = vld [vmem:[%s2838_s3 + $0x60] sm:$0xff]  ;;  %v185_v33 = vld [vmem:[%s2839_s4 + $0x48] sm:$0xff]  ;;  %v1441_v35 = vpack.c.bf16 %v56_v27, %v54_v26 }
   0x9   :  { %1436 = vmatpush1.bf16.msra.mxu0 %v1435_v15  ;;  %1498 = vmatprep.subr.bf16.mxu1 %v1497_v25  ;;  %v1499_v31 = vpack.c.bf16 %v182_v29, %v180_v28  ;;  %v187_v34 = vld [vmem:[%s2839_s4 + $0x58] sm:$0xff]  ;;  %v55_v36 = vld [vmem:[%s2838_s3 + $0x70] sm:$0xff]  ;;  %v184_v38 = vld [vmem:[%s2839_s4 + $0x40] sm:$0xff] }
   0xa   :  { %1438 = vmatprep.subr.bf16.mxu0 %v1437_v20  ;;  %v1501_v37 = vpack.c.bf16 %v187_v34, %v185_v33  ;;  %v186_v39 = vld [vmem:[%s2839_s4 + $0x50] sm:$0xff]  ;;  %v58_v40 = vld [vmem:[%s2838_s3 + $0x88] sm:$0xff]  ;;  %v60_v41 = vld [vmem:[%s2838_s3 + $0x98] sm:$0xff]  ;;  %v1443_v45 = vpack.c.bf16 %v55_v36, %v53_v32 }
   0xb   :  { %v189_v42 = vld [vmem:[%s2839_s4 + $0x68] sm:$0xff]  ;;  %v1503_v43 = vpack.c.bf16 %v186_v39, %v184_v38  ;;  %v191_v44 = vld [vmem:[%s2839_s4 + $0x78] sm:$0xff]  ;;  %v57_v46 = vld [vmem:[%s2838_s3 + $0x80] sm:$0xff]  ;;  %v1445_v50 = vpack.c.bf16 %v60_v41, %v58_v40 }
   0xc   :  { %1500 = vmatpush1.bf16.msra.mxu1 %v1499_v31  ;;  %v1505_v47 = vpack.c.bf16 %v191_v44, %v189_v42  ;;  %v188_v48 = vld [vmem:[%s2839_s4 + $0x60] sm:$0xff]  ;;  %v190_v49 = vld [vmem:[%s2839_s4 + $0x70] sm:$0xff]  ;;  %v193_v52 = vld [vmem:[%s2839_s4 + $0x88] sm:$0xff] }
   0xd   :  { %1440 = vmatpush1.bf16.msra.mxu0 %v1439_v30  ;;  %1502 = vmatprep.subr.bf16.mxu1 %v1501_v37  ;;  %v59_v51 = vld [vmem:[%s2838_s3 + $0x90] sm:$0xff]  ;;  %v195_v53 = vld [vmem:[%s2839_s4 + $0x98] sm:$0xff]  ;;  %v62_v54 = vld [vmem:[%s2838_s3 + $0xa8] sm:$0xff]  ;;  %v1507_v56 = vpack.c.bf16 %v190_v49, %v188_v48 }
   0xe   :  { %1442 = vmatprep.subr.bf16.mxu0 %v1441_v35  ;;  %v64_v55 = vld [vmem:[%s2838_s3 + $0xb8] sm:$0xff]  ;;  %v1447_v57 = vpack.c.bf16 %v59_v51, %v57_v46  ;;  %v61_v58 = vld [vmem:[%s2838_s3 + $0xa0] sm:$0xff]  ;;  %v1509_v59 = vpack.c.bf16 %v195_v53, %v193_v52  ;;  %v194_v61 = vld [vmem:[%s2839_s4 + $0x90] sm:$0xff] }
   0xf   :  { %v192_v60 = vld [vmem:[%s2839_s4 + $0x80] sm:$0xff]  ;;  %v1449_v62 = vpack.c.bf16 %v64_v55, %v62_v54  ;;  %v63_v63 = vld [vmem:[%s2838_s3 + $0xb0] sm:$0xff]  ;;  %v197_v0 = vld [vmem:[%s2839_s4 + $0xa8] sm:$0xff] }
  0x10   :  { %1504 = vmatpush1.bf16.msra.mxu1 %v1503_v43  ;;  %v199_v1 = vld [vmem:[%s2839_s4 + $0xb8] sm:$0xff]  ;;  %v66_v2 = vld [vmem:[%s2838_s3 + $0xc8] sm:$0xff]  ;;  %v1511_v4 = vpack.c.bf16 %v194_v61, %v192_v60  ;;  %v1451_v5 = vpack.c.bf16 %v63_v63, %v61_v58  ;;  %v65_v6 = vld [vmem:[%s2838_s3 + $0xc0] sm:$0xff] }
  0x11   :  { %1444 = vmatpush1.bf16.msra.mxu0 %v1443_v45  ;;  %1506 = vmatprep.subr.bf16.mxu1 %v1505_v47  ;;  %v68_v3 = vld [vmem:[%s2838_s3 + $0xd8] sm:$0xff]  ;;  %v1513_v7 = vpack.c.bf16 %v199_v1, %v197_v0  ;;  %v196_v8 = vld [vmem:[%s2839_s4 + $0xa0] sm:$0xff]  ;;  %v198_v9 = vld [vmem:[%s2839_s4 + $0xb0] sm:$0xff] }
  0x12   :  { %1446 = vmatprep.subr.bf16.mxu0 %v1445_v50  ;;  %v1453_v10 = vpack.c.bf16 %v68_v3, %v66_v2  ;;  %v67_v11 = vld [vmem:[%s2838_s3 + $0xd0] sm:$0xff]  ;;  %v201_v12 = vld [vmem:[%s2839_s4 + $0xc8] sm:$0xff]  ;;  %v203_v13 = vld [vmem:[%s2839_s4 + $0xd8] sm:$0xff]  ;;  %v1515_v16 = vpack.c.bf16 %v198_v9, %v196_v8 }
  0x13   :  { %v70_v14 = vld [vmem:[%s2838_s3 + $0xe8] sm:$0xff]  ;;  %v72_v15 = vld [vmem:[%s2838_s3 + $0xf8] sm:$0xff]  ;;  %v1455_v17 = vpack.c.bf16 %v67_v11, %v65_v6  ;;  %v69_v18 = vld [vmem:[%s2838_s3 + $0xe0] sm:$0xff]  ;;  %v1517_v19 = vpack.c.bf16 %v203_v13, %v201_v12 }
  0x14   :  { %1508 = vmatpush1.bf16.msra.mxu1 %v1507_v56  ;;  %v200_v20 = vld [vmem:[%s2839_s4 + $0xc0] sm:$0xff]  ;;  %v202_v21 = vld [vmem:[%s2839_s4 + $0xd0] sm:$0xff]  ;;  %v1457_v22 = vpack.c.bf16 %v72_v15, %v70_v14  ;;  %v205_v24 = vld [vmem:[%s2839_s4 + $0xe8] sm:$0xff] }
  0x15   :  { %1448 = vmatpush1.bf16.msra.mxu0 %v1447_v57  ;;  %1510 = vmatprep.subr.bf16.mxu1 %v1509_v59  ;;  %v71_v23 = vld [vmem:[%s2838_s3 + $0xf0] sm:$0xff]  ;;  %v207_v25 = vld [vmem:[%s2839_s4 + $0xf8] sm:$0xff]  ;;  %v74_v26 = vld [vmem:[%s2838_s3 + $0x108] sm:$0xff]  ;;  %v1519_v28 = vpack.c.bf16 %v202_v21, %v200_v20 }
  0x16   :  { %1450 = vmatprep.subr.bf16.mxu0 %v1449_v62  ;;  %v76_v27 = vld [vmem:[%s2838_s3 + $0x118] sm:$0xff]  ;;  %v1459_v29 = vpack.c.bf16 %v71_v23, %v69_v18  ;;  %v73_v30 = vld [vmem:[%s2838_s3 + $0x100] sm:$0xff]  ;;  %v1521_v31 = vpack.c.bf16 %v207_v25, %v205_v24  ;;  %v206_v33 = vld [vmem:[%s2839_s4 + $0xf0] sm:$0xff] }
  0x17   :  { %v204_v32 = vld [vmem:[%s2839_s4 + $0xe0] sm:$0xff]  ;;  %v1461_v34 = vpack.c.bf16 %v76_v27, %v74_v26  ;;  %v75_v35 = vld [vmem:[%s2838_s3 + $0x110] sm:$0xff]  ;;  %v209_v36 = vld [vmem:[%s2839_s4 + $0x108] sm:$0xff] }
  0x18   :  { %1512 = vmatpush1.bf16.msra.mxu1 %v1511_v4  ;;  %v211_v37 = vld [vmem:[%s2839_s4 + $0x118] sm:$0xff]  ;;  %v78_v38 = vld [vmem:[%s2838_s3 + $0x128] sm:$0xff]  ;;  %v1523_v40 = vpack.c.bf16 %v206_v33, %v204_v32  ;;  %v1463_v41 = vpack.c.bf16 %v75_v35, %v73_v30  ;;  %v77_v42 = vld [vmem:[%s2838_s3 + $0x120] sm:$0xff] }
  0x19   :  { %1452 = vmatpush1.bf16.msra.mxu0 %v1451_v5  ;;  %1514 = vmatprep.subr.bf16.mxu1 %v1513_v7  ;;  %v80_v39 = vld [vmem:[%s2838_s3 + $0x138] sm:$0xff]  ;;  %v1525_v43 = vpack.c.bf16 %v211_v37, %v209_v36  ;;  %v208_v44 = vld [vmem:[%s2839_s4 + $0x100] sm:$0xff]  ;;  %v210_v45 = vld [vmem:[%s2839_s4 + $0x110] sm:$0xff] }
  0x1a   :  { %1454 = vmatprep.subr.bf16.mxu0 %v1453_v10  ;;  %v1465_v46 = vpack.c.bf16 %v80_v39, %v78_v38  ;;  %v79_v47 = vld [vmem:[%s2838_s3 + $0x130] sm:$0xff]  ;;  %v213_v48 = vld [vmem:[%s2839_s4 + $0x128] sm:$0xff]  ;;  %v215_v49 = vld [vmem:[%s2839_s4 + $0x138] sm:$0xff]  ;;  %v1527_v52 = vpack.c.bf16 %v210_v45, %v208_v44 }
  0x1b   :  { %v82_v50 = vld [vmem:[%s2838_s3 + $0x148] sm:$0xff]  ;;  %v84_v51 = vld [vmem:[%s2838_s3 + $0x158] sm:$0xff]  ;;  %v1467_v53 = vpack.c.bf16 %v79_v47, %v77_v42  ;;  %v81_v54 = vld [vmem:[%s2838_s3 + $0x140] sm:$0xff]  ;;  %v1529_v55 = vpack.c.bf16 %v215_v49, %v213_v48 }
  0x1c   :  { %1516 = vmatpush1.bf16.msra.mxu1 %v1515_v16  ;;  %v212_v56 = vld [vmem:[%s2839_s4 + $0x120] sm:$0xff]  ;;  %v214_v57 = vld [vmem:[%s2839_s4 + $0x130] sm:$0xff]  ;;  %v1469_v58 = vpack.c.bf16 %v84_v51, %v82_v50  ;;  %v217_v60 = vld [vmem:[%s2839_s4 + $0x148] sm:$0xff] }
  0x1d   :  { %1456 = vmatpush1.bf16.msra.mxu0 %v1455_v17  ;;  %1518 = vmatprep.subr.bf16.mxu1 %v1517_v19  ;;  %v83_v59 = vld [vmem:[%s2838_s3 + $0x150] sm:$0xff]  ;;  %v219_v61 = vld [vmem:[%s2839_s4 + $0x158] sm:$0xff]  ;;  %v86_v62 = vld [vmem:[%s2838_s3 + $0x168] sm:$0xff]  ;;  %v1531_v0 = vpack.c.bf16 %v214_v57, %v212_v56 }
  0x1e   :  { %1458 = vmatprep.subr.bf16.mxu0 %v1457_v22  ;;  %v88_v63 = vld [vmem:[%s2838_s3 + $0x178] sm:$0xff]  ;;  %v85_v1 = vld [vmem:[%s2838_s3 + $0x160] sm:$0xff]  ;;  %v1471_v2 = vpack.c.bf16 %v83_v59, %v81_v54  ;;  %v1533_v3 = vpack.c.bf16 %v219_v61, %v217_v60  ;;  %v218_v5 = vld [vmem:[%s2839_s4 + $0x150] sm:$0xff] }
  0x1f   :  { %v216_v4 = vld [vmem:[%s2839_s4 + $0x140] sm:$0xff]  ;;  %v36_v6 = vld [vmem:[%s2840_s0 + $0x8] sm:$0xff]  ;;  %v1473_v7 = vpack.c.bf16 %v88_v63, %v86_v62  ;;  %v87_v8 = vld [vmem:[%s2838_s3 + $0x170] sm:$0xff] }
  0x20   :  { %1520 = vmatpush1.bf16.msra.mxu1 %v1519_v28  ;;  %v221_v9 = vld [vmem:[%s2839_s4 + $0x168] sm:$0xff]  ;;  %v223_v10 = vld [vmem:[%s2839_s4 + $0x178] sm:$0xff]  ;;  %169 = vmatprep.mubr.f32.mxu0 %v36_v6  ;;  %v1535_v13 = vpack.c.bf16 %v218_v5, %v216_v4  ;;  %v1475_v15 = vpack.c.bf16 %v87_v8, %v85_v1  ;;  %v89_v16 = vld [vmem:[%s2838_s3 + $0x180] sm:$0xff] }
  0x21   :  { %1460 = vmatpush1.bf16.msra.mxu0 %v1459_v29  ;;  %1522 = vmatprep.subr.bf16.mxu1 %v1521_v31  ;;  %v90_v11 = vld [vmem:[%s2838_s3 + $0x188] sm:$0xff]  ;;  %v92_v12 = vld [vmem:[%s2838_s3 + $0x198] sm:$0xff]  ;;  %v1537_v17 = vpack.c.bf16 %v223_v10, %v221_v9  ;;  %v220_v18 = vld [vmem:[%s2839_s4 + $0x160] sm:$0xff] }
  0x22   :  { %1462 = vmatprep.subr.bf16.mxu0 %v1461_v34  ;;  %v38_v14 = vld [vmem:[%s2841_s1 + $0x8] sm:$0xff]  ;;  %v222_v19 = vld [vmem:[%s2839_s4 + $0x170] sm:$0xff]  ;;  %v1477_v20 = vpack.c.bf16 %v92_v12, %v90_v11  ;;  %v227_v23 = vld [vmem:[%s2839_s4 + $0x198] sm:$0xff] }
  0x23   :  { %v91_v21 = vld [vmem:[%s2838_s3 + $0x190] sm:$0xff]  ;;  %v225_v22 = vld [vmem:[%s2839_s4 + $0x188] sm:$0xff]  ;;  %304 = vmatprep.mubr.f32.mxu1 %v38_v14  ;;  %v96_v25 = vld [vmem:[%s2838_s3 + $0x1b8] sm:$0xff]  ;;  %v1539_v26 = vpack.c.bf16 %v222_v19, %v220_v18 }
  0x24   :  { %1524 = vmatpush1.bf16.msra.mxu1 %v1523_v40  ;;  %v94_v24 = vld [vmem:[%s2838_s3 + $0x1a8] sm:$0xff]  ;;  %v1479_v27 = vpack.c.bf16 %v91_v21, %v89_v16  ;;  %v93_v28 = vld [vmem:[%s2838_s3 + $0x1a0] sm:$0xff]  ;;  %v1541_v29 = vpack.c.bf16 %v227_v23, %v225_v22  ;;  %v226_v31 = vld [vmem:[%s2839_s4 + $0x190] sm:$0xff] }
  0x25   :  { %1464 = vmatpush1.bf16.msra.mxu0 %v1463_v41  ;;  %1526 = vmatprep.subr.bf16.mxu1 %v1525_v43  ;;  %v224_v30 = vld [vmem:[%s2839_s4 + $0x180] sm:$0xff]  ;;  %v1481_v32 = vpack.c.bf16 %v96_v25, %v94_v24  ;;  %v95_v33 = vld [vmem:[%s2838_s3 + $0x1b0] sm:$0xff]  ;;  %v229_v34 = vld [vmem:[%s2839_s4 + $0x1a8] sm:$0xff] }
  0x26   :  { %1466 = vmatprep.subr.bf16.mxu0 %v1465_v46  ;;  %v231_v35 = vld [vmem:[%s2839_s4 + $0x1b8] sm:$0xff]  ;;  %v98_v36 = vld [vmem:[%s2838_s3 + $0x1c8] sm:$0xff]  ;;  %v1543_v38 = vpack.c.bf16 %v226_v31, %v224_v30  ;;  %v1483_v39 = vpack.c.bf16 %v95_v33, %v93_v28  ;;  %v97_v40 = vld [vmem:[%s2838_s3 + $0x1c0] sm:$0xff] }
  0x27   :  { %v100_v37 = vld [vmem:[%s2838_s3 + $0x1d8] sm:$0xff]  ;;  %v1545_v41 = vpack.c.bf16 %v231_v35, %v229_v34  ;;  %v228_v42 = vld [vmem:[%s2839_s4 + $0x1a0] sm:$0xff]  ;;  %v230_v43 = vld [vmem:[%s2839_s4 + $0x1b0] sm:$0xff] }
  0x28   :  { %1528 = vmatpush1.bf16.msra.mxu1 %v1527_v52  ;;  %v1485_v44 = vpack.c.bf16 %v100_v37, %v98_v36  ;;  %v99_v45 = vld [vmem:[%s2838_s3 + $0x1d0] sm:$0xff]  ;;  %v233_v46 = vld [vmem:[%s2839_s4 + $0x1c8] sm:$0xff]  ;;  %v235_v47 = vld [vmem:[%s2839_s4 + $0x1d8] sm:$0xff]  ;;  %v1547_v50 = vpack.c.bf16 %v230_v43, %v228_v42 }
  0x29   :  { %1468 = vmatpush1.bf16.msra.mxu0 %v1467_v53  ;;  %1530 = vmatprep.subr.bf16.mxu1 %v1529_v55  ;;  %v102_v48 = vld [vmem:[%s2838_s3 + $0x1e8] sm:$0xff]  ;;  %v104_v49 = vld [vmem:[%s2838_s3 + $0x1f8] sm:$0xff]  ;;  %v1487_v51 = vpack.c.bf16 %v99_v45, %v97_v40  ;;  %v101_v52 = vld [vmem:[%s2838_s3 + $0x1e0] sm:$0xff]  ;;  %v1549_v53 = vpack.c.bf16 %v235_v47, %v233_v46 }
  0x2a   :  { %1470 = vmatprep.subr.bf16.mxu0 %v1469_v58  ;;  %v232_v54 = vld [vmem:[%s2839_s4 + $0x1c0] sm:$0xff]  ;;  %v234_v55 = vld [vmem:[%s2839_s4 + $0x1d0] sm:$0xff]  ;;  %v1489_v56 = vpack.c.bf16 %v104_v49, %v102_v48  ;;  %v237_v58 = vld [vmem:[%s2839_s4 + $0x1e8] sm:$0xff] }
  0x2b   :  { %v103_v57 = vld [vmem:[%s2838_s3 + $0x1f0] sm:$0xff]  ;;  %v239_v59 = vld [vmem:[%s2839_s4 + $0x1f8] sm:$0xff]  ;;  %v1551_v60 = vpack.c.bf16 %v234_v55, %v232_v54  ;;  %v236_v63 = vld [vmem:[%s2839_s4 + $0x1e0] sm:$0xff] }
  0x2c   :  { %1532 = vmatpush1.bf16.msra.mxu1 %v1531_v0  ;;  %v1491_v61 = vpack.c.bf16 %v103_v57, %v101_v52  ;;  %v1553_v62 = vpack.c.bf16 %v239_v59, %v237_v58  ;;  %v238_v0 = vld [vmem:[%s2839_s4 + $0x1f0] sm:$0xff]  ;;  %v610_v1 = vld [vmem:[%s2842_s8 + $0x80] sm:$0xff]  ;;  %v613_v9 = vld [vmem:[%s2842_s8 + $0x98] sm:$0xff]  ;;  %v1759_v58 = vmov 1966171168  }
  0x2d   :  { %1472 = vmatpush1.bf16.msra.mxu0 %v1471_v2  ;;  %1534 = vmatprep.subr.bf16.mxu1 %v1533_v3  ;;  %v611_v2 = vld [vmem:[%s2842_s8 + $0x88] sm:$0xff]  ;;  %v1555_v3 = vpack.c.bf16 %v238_v0, %v236_v63  ;;  %v35_v4 = vld [vmem:[%s2840_s0] sm:$0xff]  ;;  %v612_v8 = vld [vmem:[%s2842_s8 + $0x90] sm:$0xff]  ;;  %v451_v59 = vunpack.c.l.s4 %v1759_v58 }
  0x2e   :  { %1474 = vmatprep.subr.bf16.mxu0 %v1473_v7  ;;  %v1621_v5 = vpack.c.bf16 %v611_v2, %v610_v1  ;;  %v594_v6 = vld [vmem:[%s2842_s8] sm:$0xff]  ;;  %v595_v7 = vld [vmem:[%s2842_s8 + $0x8] sm:$0xff]  ;;  %v1625_v12 = vpack.c.bf16 %v613_v9, %v612_v8  ;;  %v597_v14 = vld [vmem:[%s2842_s8 + $0x18] sm:$0xff] }
  0x2f   :  { %v37_v10 = vld [vmem:[%s2841_s1] sm:$0xff]  ;;  %v1623_v11 = vpack.c.bf16 %v595_v7, %v594_v6  ;;  %v615_v16 = vld [vmem:[%s2842_s8 + $0xa8] sm:$0xff]  ;;  %v616_v21 = vld [vmem:[%s2842_s8 + $0xb0] sm:$0xff] }
  0x30   :  { %1536 = vmatpush1.bf16.msra.mxu1 %v1535_v13  ;;  %v596_v13 = vld [vmem:[%s2842_s8 + $0x10] sm:$0xff]  ;;  %v598_v19 = vld [vmem:[%s2842_s8 + $0x20] sm:$0xff]  ;;  %v617_v22 = vld [vmem:[%s2842_s8 + $0xb8] sm:$0xff] }
  0x31   :  { %1476 = vmatpush1.bf16.msra.mxu0 %v1475_v15  ;;  %1538 = vmatprep.subr.bf16.mxu1 %v1537_v17  ;;  %v614_v15 = vld [vmem:[%s2842_s8 + $0xa0] sm:$0xff]  ;;  %v1627_v17 = vpack.c.bf16 %v597_v14, %v596_v13  ;;  %v1633_v24 = vpack.c.bf16 %v617_v22, %v616_v21  ;;  %v600_v25 = vld [vmem:[%s2842_s8 + $0x30] sm:$0xff]  ;;  %v619_v28 = vld [vmem:[%s2842_s8 + $0xc8] sm:$0xff] }
  0x32   :  { %1478 = vmatprep.subr.bf16.mxu0 %v1477_v20  ;;  %v1629_v18 = vpack.c.bf16 %v615_v16, %v614_v15  ;;  %v599_v20 = vld [vmem:[%s2842_s8 + $0x28] sm:$0xff]  ;;  %v602_v31 = vld [vmem:[%s2842_s8 + $0x40] sm:$0xff]  ;;  %v620_v34 = vld [vmem:[%s2842_s8 + $0xd0] sm:$0xff] }
  0x33   :  { %v1631_v23 = vpack.c.bf16 %v599_v20, %v598_v19  ;;  %v621_v35 = vld [vmem:[%s2842_s8 + $0xd8] sm:$0xff]  ;;  %v604_v37 = vld [vmem:[%s2842_s8 + $0x50] sm:$0xff]  ;;  %v622_v40 = vld [vmem:[%s2842_s8 + $0xe0] sm:$0xff] }
  0x34   :  { %1540 = vmatpush1.bf16.msra.mxu1 %v1539_v26  ;;  %v601_v26 = vld [vmem:[%s2842_s8 + $0x38] sm:$0xff]  ;;  %v1641_v36 = vpack.c.bf16 %v621_v35, %v620_v34  ;;  %v606_v43 = vld [vmem:[%s2842_s8 + $0x60] sm:$0xff]  ;;  %v624_v46 = vld [vmem:[%s2842_s8 + $0xf0] sm:$0xff] }
  0x35   :  { %1480 = vmatpush1.bf16.msra.mxu0 %v1479_v27  ;;  %1542 = vmatprep.subr.bf16.mxu1 %v1541_v29  ;;  %v618_v27 = vld [vmem:[%s2842_s8 + $0xc0] sm:$0xff]  ;;  %v1635_v29 = vpack.c.bf16 %v601_v26, %v600_v25  ;;  %v625_v47 = vld [vmem:[%s2842_s8 + $0xf8] sm:$0xff]  ;;  %v608_v49 = vld [vmem:[%s2842_s8 + $0x70] sm:$0xff] }
  0x36   :  { %1482 = vmatprep.subr.bf16.mxu0 %v1481_v32  ;;  %v1637_v30 = vpack.c.bf16 %v619_v28, %v618_v27  ;;  %v603_v32 = vld [vmem:[%s2842_s8 + $0x48] sm:$0xff]  ;;  %v1649_v48 = vpack.c.bf16 %v625_v47, %v624_v46  ;;  %v311_v54 = vld [vmem:[%s2843_s5] sm:$0xff] }
  0x37   :  { %v1639_v33 = vpack.c.bf16 %v603_v32, %v602_v31  ;;  %v312_v52 = vld [vmem:[%s2843_s5 + $0x8] sm:$0xff] }
  0x38   :  { %1544 = vmatpush1.bf16.msra.mxu1 %v1543_v38  ;;  %v605_v38 = vld [vmem:[%s2842_s8 + $0x58] sm:$0xff]  ;;  %v320_v58 = vld [vmem:[%s2843_s5 + $0x48] sm:$0xff] }
  0x39   :  { %1484 = vmatpush1.bf16.msra.mxu0 %v1483_v39  ;;  %1546 = vmatprep.subr.bf16.mxu1 %v1545_v41  ;;  %v1643_v39 = vpack.c.bf16 %v605_v38, %v604_v37  ;;  %v623_v41 = vld [vmem:[%s2842_s8 + $0xe8] sm:$0xff] }
  0x3a   :  { %1486 = vmatprep.subr.bf16.mxu0 %v1485_v44  ;;  %v1645_v42 = vpack.c.bf16 %v623_v41, %v622_v40  ;;  %v607_v44 = vld [vmem:[%s2842_s8 + $0x68] sm:$0xff] }
  0x3b   :  { %v1647_v45 = vpack.c.bf16 %v607_v44, %v606_v43 }
  0x3c   :  { %1548 = vmatpush1.bf16.msra.mxu1 %v1547_v50  ;;  %v609_v50 = vld [vmem:[%s2842_s8 + $0x78] sm:$0xff] }
  0x3d   :  { %1488 = vmatpush1.bf16.msra.mxu0 %v1487_v51  ;;  %1550 = vmatprep.subr.bf16.mxu1 %v1549_v53  ;;  %v1651_v51 = vpack.c.bf16 %v609_v50, %v608_v49  ;;  %v314_v53 = vld [vmem:[%s2843_s5 + $0x18] sm:$0xff] }
  0x3e   :  { %1490 = vmatprep.subr.bf16.mxu0 %v1489_v56  ;;  %v1557_v55 = vpack.c.bf16 %v314_v53, %v312_v52  ;;  %v313_v56 = vld [vmem:[%s2843_s5 + $0x10] sm:$0xff]  ;;  %v316_v52 = vld [vmem:[%s2843_s5 + $0x28] sm:$0xff]  ;;  %v318_v53 = vld [vmem:[%s2843_s5 + $0x38] sm:$0xff] }
  0x3f   :  { %v1559_v57 = vpack.c.bf16 %v313_v56, %v311_v54  ;;  %v1561_v54 = vpack.c.bf16 %v318_v53, %v316_v52  ;;  %v317_v56 = vld [vmem:[%s2843_s5 + $0x30] sm:$0xff]  ;;  %v355_v53 = vld [vmem:[%s2843_s5 + $0x160] sm:$0xff] }
  0x40   :  { %1552 = vmatpush1.bf16.msra.mxu1 %v1551_v60  ;;  %v453_v60 = vlaneseq }
  0x41   :  { %1492 = vmatpush1.bf16.msra.mxu0 %v1491_v61  ;;  %1554 = vmatprep.subr.bf16.mxu1 %v1553_v62  ;;  %v452_v61 = vunpack.c.0.s8 %v451_v59  ;;  %v322_v59 = vld [vmem:[%s2843_s5 + $0x58] sm:$0xff] }
  0x42   :  { %1558 = vmatprep.subr.bf16.mxu0 %v1557_v55  ;;  %v454_v62 = vshrl.u32 %v453_v60, 7  ;;  %v315_v55 = vld [vmem:[%s2843_s5 + $0x20] sm:$0xff]  ;;  %v1565_v60 = vpack.c.bf16 %v322_v59, %v320_v58 }
  0x43   :  { %v359_v59 = vld [vmem:[%s2843_s5 + $0x180] sm:$0xff] }
  0x44   :  { %170 = vmatmul.mubr.f32.vlgmr.msra.gmra.mrb[0].mxu0 %v35_v4  ;;  %1556 = vmatpush1.bf16.msra.mxu1 %v1555_v3  ;;  %v455_v0 = vsub.s32 %v452_v61, %v454_v62  ;;  %v2320_v7 = vsub.s32 0, %v454_v62  ;;  %v2322_v8 = vsub.s32 1, %v454_v62  ;;  %v319_v61 = vld [vmem:[%s2843_s5 + $0x40] sm:$0xff]  ;;  %v321_v62 = vld [vmem:[%s2843_s5 + $0x50] sm:$0xff] }
  0x45   :  { %1622 = vmatprep.subr.bf16.mxu1 %v1621_v5  ;;  %1560 = vmatpush1.bf16.msra.mxu0 %v1559_v57  ;;  %v1563_v57 = vpack.c.bf16 %v317_v56, %v315_v55  ;;  %v360_v56 = vld [vmem:[%s2843_s5 + $0x188] sm:$0xff] }
  0x46   :  { %1562 = vmatprep.subr.bf16.mxu0 %v1561_v54  ;;  %v357_v54 = vld [vmem:[%s2843_s5 + $0x170] sm:$0xff] }
  0x47   :  { %305 = vmatmul.mubr.f32.vlgmr.msra.gmra.mrb[0].mxu1 %v37_v10  ;;  %v1603_v55 = vpack.c.bf16 %v357_v54, %v355_v53  ;;  %v1177_v54 = vld [vmem:[%s2846_s6 + $0x60] sm:$0xff] }
  0x48   :  { %1624 = vmatpush3.bf16.msra.mxu1 %v1623_v11 }
  0x49   :  { %1626 = vmatprep.subr.bf16.mxu1 %v1625_v12  ;;  %1564 = vmatpush1.bf16.msra.mxu0 %v1563_v57  ;;  %v362_v57 = vld [vmem:[%s2843_s5 + $0x198] sm:$0xff] }
  0x4a   :  { %1566 = vmatprep.subr.bf16.mxu0 %v1565_v60  ;;  %v1605_v58 = vpack.c.bf16 %v362_v57, %v360_v56  ;;  %v361_v60 = vld [vmem:[%s2843_s5 + $0x190] sm:$0xff]  ;;  %v1182_v56 = vld [vmem:[%s2846_s6 + $0x88] sm:$0xff]  ;;  %v1184_v57 = vld [vmem:[%s2846_s6 + $0x98] sm:$0xff] }
  0x4c   :  { %1628 = vmatpush3.bf16.msra.mxu1 %v1627_v17 }
  0x4d   :  { %1630 = vmatprep.subr.bf16.mxu1 %v1629_v18 }
  0x50   :  { %1632 = vmatpush3.bf16.msra.mxu1 %v1631_v23 }
  0x51   :  { %1634 = vmatprep.subr.bf16.mxu1 %v1633_v24 }
  0x54   :  { %1636 = vmatpush3.bf16.msra.mxu1 %v1635_v29 }
  0x55   :  { %1638 = vmatprep.subr.bf16.mxu1 %v1637_v30 }
  0x58   :  { %1640 = vmatpush3.bf16.msra.mxu1 %v1639_v33 }
  0x59   :  { %1642 = vmatprep.subr.bf16.mxu1 %v1641_v36 }
  0x5c   :  { %1644 = vmatpush3.bf16.msra.mxu1 %v1643_v39 }
  0x5d   :  { %1646 = vmatprep.subr.bf16.mxu1 %v1645_v42 }
  0x60   :  { %1648 = vmatpush3.bf16.msra.mxu1 %v1647_v45 }
  0x61   :  { %1650 = vmatprep.subr.bf16.mxu1 %v1649_v48 }
  0x64   :  { %1652 = vmatpush3.bf16.msra.mxu1 %v1651_v51 }
 0x117   :  { %v171_v63 = vpop.f32.mrb[0].mxu0 }
 0x118   :  { %v173_v1 = vpop.f32.mrb[1].mxu0 }
 0x119   :  { %v448_v2 = vcombine.low %v171_v63, %v173_v1  ;;  %v449_v3 = vcombine.high %v171_v63, %v173_v1  ;;  %v1567_v63 = vpack.c.bf16 %v321_v62, %v319_v61  ;;  %v326_v1 = vld [vmem:[%s2843_s5 + $0x78] sm:$0xff]  ;;  %v1607_v61 = vpack.c.bf16 %v361_v60, %v359_v59  ;;  %v364_v62 = vld [vmem:[%s2843_s5 + $0x1a8] sm:$0xff]  ;;  %v1181_v60 = vld [vmem:[%s2846_s6 + $0x80] sm:$0xff] }
 0x11a   :  { %v306_v4 = vpop.f32.mrb[0].mxu1  ;;  %v1677_v59 = vpack.c.bf16 %v1184_v57, %v1182_v56 }
 0x11b   :  { %v456_v5 = vrot.slane %v448_v2, %v455_v0  ;;  %v463_v6 = vrot.slane %v449_v3, %v455_v0  ;;  %v308_v9 = vpop.f32.mrb[1].mxu1  ;;  %1568 = vmatpush1.bf16.msra.mxu0 %v1567_v63  ;;  %v323_v3 = vld [vmem:[%s2843_s5 + $0x60] sm:$0xff]  ;;  %v366_v63 = vld [vmem:[%s2843_s5 + $0x1b8] sm:$0xff] }
 0x11d   :  { %v464_v10 = vcombine.high %v456_v5, %v456_v5  ;;  %v465_v11 = vcombine.high %v463_v6, %v463_v6  ;;  %v472_v12 = vrot.slane %v456_v5, %v455_v0  ;;  %v479_v13 = vrot.slane %v463_v6, %v455_v0  ;;  %v328_v6 = vld [vmem:[%s2843_s5 + $0x88] sm:$0xff] }
 0x11f   :  { %v486_v14 = vrot.slane %v464_v10, %v455_v0  ;;  %v493_v15 = vrot.slane %v465_v11, %v455_v0  ;;  %v505_v16 = vrot.slane %v472_v12, %v2322_v8  ;;  %v501_v17 = vrot.slane %v472_v12, %v2320_v7  ;;  %v324_v0 = vld [vmem:[%s2843_s5 + $0x68] sm:$0xff]  ;;  %v327_v11 = vld [vmem:[%s2843_s5 + $0x80] sm:$0xff] }
 0x120   :  { %v494_v18 = vcombine.high %v472_v12, %v472_v12  ;;  %v537_v19 = vrot.slane %v479_v13, %v2322_v8  ;;  %v533_v20 = vrot.slane %v479_v13, %v2320_v7  ;;  %v495_v21 = vcombine.high %v479_v13, %v479_v13  ;;  %v329_v12 = vld [vmem:[%s2843_s5 + $0x90] sm:$0xff] }
 0x121   :  { %v579_v22 = vmul.f32 %v505_v16, %v308_v9  ;;  %v578_v23 = vmul.f32 %v501_v17, %v306_v4  ;;  %v513_v24 = vrot.slane %v486_v14, %v2322_v8  ;;  %v509_v25 = vrot.slane %v486_v14, %v2320_v7  ;;  %v331_v17 = vld [vmem:[%s2843_s5 + $0xa0] sm:$0xff] }
 0x122   :  { %v521_v26 = vrot.slane %v494_v18, %v2322_v8  ;;  %v517_v27 = vrot.slane %v494_v18, %v2320_v7  ;;  %v496_v28 = vcombine.high %v486_v14, %v486_v14  ;;  %v587_v29 = vmul.f32 %v537_v19, %v308_v9  ;;  %v332_v14 = vld [vmem:[%s2843_s5 + $0xa8] sm:$0xff]  ;;  %v333_v18 = vld [vmem:[%s2843_s5 + $0xb0] sm:$0xff] }
 0x123   :  { %690 = vmatprep.mubr.f32.mxu1 %v579_v22  ;;  %v581_v30 = vmul.f32 %v513_v24, %v308_v9  ;;  %v580_v31 = vmul.f32 %v509_v25, %v306_v4  ;;  %v586_v32 = vmul.f32 %v533_v20, %v306_v4  ;;  %v545_v33 = vrot.slane %v493_v15, %v2322_v8  ;;  %v336_v20 = vld [vmem:[%s2843_s5 + $0xc8] sm:$0xff]  ;;  %v337_v24 = vld [vmem:[%s2843_s5 + $0xd0] sm:$0xff] }
 0x124   :  { %691 = vmatmul.mubr.f32.vlgmr.msra.gmra.mrb[2].mxu1 %v578_v23  ;;  %v583_v34 = vmul.f32 %v521_v26, %v308_v9  ;;  %v582_v35 = vmul.f32 %v517_v27, %v306_v4  ;;  %v529_v36 = vrot.slane %v496_v28, %v2322_v8  ;;  %v525_v37 = vrot.slane %v496_v28, %v2320_v7  ;;  %v335_v23 = vld [vmem:[%s2843_s5 + $0xc0] sm:$0xff]  ;;  %v340_v26 = vld [vmem:[%s2843_s5 + $0xe8] sm:$0xff]  ;;  %v342_v27 = vld [vmem:[%s2843_s5 + $0xf8] sm:$0xff] }
 0x125   :  { %695 = vmatprep.mubr.f32.mxu1 %v581_v30  ;;  %v589_v38 = vmul.f32 %v545_v33, %v308_v9  ;;  %v541_v39 = vrot.slane %v493_v15, %v2320_v7  ;;  %v553_v40 = vrot.slane %v495_v21, %v2322_v8  ;;  %v549_v41 = vrot.slane %v495_v21, %v2320_v7  ;;  %v338_v21 = vld [vmem:[%s2843_s5 + $0xd8] sm:$0xff]  ;;  %v341_v30 = vld [vmem:[%s2843_s5 + $0xf0] sm:$0xff] }
 0x126   :  { %v585_v42 = vmul.f32 %v529_v36, %v308_v9  ;;  %v584_v43 = vmul.f32 %v525_v37, %v306_v4  ;;  %v497_v44 = vcombine.high %v493_v15, %v493_v15  ;;  %v1569_v2 = vpack.c.bf16 %v326_v1, %v324_v0  ;;  %v334_v15 = vld [vmem:[%s2843_s5 + $0xb8] sm:$0xff]  ;;  %v345_v36 = vld [vmem:[%s2843_s5 + $0x110] sm:$0xff]  ;;  %v363_v1 = vld [vmem:[%s2843_s5 + $0x1a0] sm:$0xff] }
 0x127   :  { %v588_v45 = vmul.f32 %v541_v39, %v306_v4  ;;  %v591_v46 = vmul.f32 %v553_v40, %v308_v9  ;;  %v590_v47 = vmul.f32 %v549_v41, %v306_v4  ;;  %v1575_v13 = vpack.c.bf16 %v329_v12, %v327_v11  ;;  %v346_v33 = vld [vmem:[%s2843_s5 + $0x118] sm:$0xff]  ;;  %v347_v41 = vld [vmem:[%s2843_s5 + $0x120] sm:$0xff]  ;;  %v910_v11 = vld [vmem:[%s2844_s9 + $0x10] sm:$0xff] }
 0x128   :  { %696 = vmatmul.mubr.f32.gmra.mrb[4].mxu1 %v580_v31  ;;  %v561_v48 = vrot.slane %v497_v44, %v2322_v8  ;;  %v557_v49 = vrot.slane %v497_v44, %v2320_v7  ;;  %1570 = vmatprep.subr.bf16.mxu0 %v1569_v2  ;;  %v1577_v16 = vpack.c.bf16 %v334_v15, %v332_v14  ;;  %v350_v39 = vld [vmem:[%s2843_s5 + $0x138] sm:$0xff]  ;;  %v352_v44 = vld [vmem:[%s2843_s5 + $0x148] sm:$0xff]  ;;  %v365_v2 = vld [vmem:[%s2843_s5 + $0x1b0] sm:$0xff] }
 0x129   :  { %700 = vmatprep.mubr.f32.mxu1 %v583_v34  ;;  %v1579_v19 = vpack.c.bf16 %v333_v18, %v331_v17  ;;  %v1581_v22 = vpack.c.bf16 %v338_v21, %v336_v20  ;;  %v1583_v25 = vpack.c.bf16 %v337_v24, %v335_v23  ;;  %v1585_v28 = vpack.c.bf16 %v342_v27, %v340_v26  ;;  %v370_v12 = vld [vmem:[%s2843_s5 + $0x1d8] sm:$0xff]  ;;  %v367_v15 = vld [vmem:[%s2843_s5 + $0x1c0] sm:$0xff]  ;;  %v913_v18 = vld [vmem:[%s2844_s9 + $0x28] sm:$0xff] }
 0x12a   :  { %v593_v50 = vmul.f32 %v561_v48, %v308_v9  ;;  %v592_v51 = vmul.f32 %v557_v49, %v306_v4  ;;  %v325_v4 = vld [vmem:[%s2843_s5 + $0x70] sm:$0xff]  ;;  %v330_v9 = vld [vmem:[%s2843_s5 + $0x98] sm:$0xff]  ;;  %v1609_v0 = vpack.c.bf16 %v366_v63, %v364_v62  ;;  %v372_v20 = vld [vmem:[%s2843_s5 + $0x1e8] sm:$0xff] }
 0x12b   :  { %v1571_v5 = vpack.c.bf16 %v325_v4, %v323_v3  ;;  %v1573_v10 = vpack.c.bf16 %v330_v9, %v328_v6  ;;  %v353_v48 = vld [vmem:[%s2843_s5 + $0x150] sm:$0xff]  ;;  %v1611_v3 = vpack.c.bf16 %v365_v2, %v363_v1  ;;  %v909_v4 = vld [vmem:[%s2844_s9 + $0x8] sm:$0xff]  ;;  %v374_v24 = vld [vmem:[%s2843_s5 + $0x1f8] sm:$0xff] }
 0x12c   :  { %701 = vmatmul.mubr.f32.gmra.mrb[6].mxu1 %v582_v35  ;;  %v343_v35 = vld [vmem:[%s2843_s5 + $0x100] sm:$0xff]  ;;  %v368_v6 = vld [vmem:[%s2843_s5 + $0x1c8] sm:$0xff]  ;;  %v914_v23 = vld [vmem:[%s2844_s9 + $0x30] sm:$0xff]  ;;  %v1617_v26 = vpack.c.bf16 %v374_v24, %v372_v20 }
 0x12d   :  { %705 = vmatprep.mubr.f32.mxu1 %v585_v42  ;;  %1572 = vmatpush1.bf16.msra.mxu0 %v1571_v5  ;;  %v1591_v37 = vpack.c.bf16 %v345_v36, %v343_v35  ;;  %v349_v42 = vld [vmem:[%s2843_s5 + $0x130] sm:$0xff]  ;;  %v911_v5 = vld [vmem:[%s2844_s9 + $0x18] sm:$0xff]  ;;  %v1613_v14 = vpack.c.bf16 %v370_v12, %v368_v6  ;;  %v371_v27 = vld [vmem:[%s2843_s5 + $0x1e0] sm:$0xff] }
 0x12e   :  { %1574 = vmatprep.subr.bf16.mxu0 %v1573_v10  ;;  %v1653_v9 = vpack.c.bf16 %v911_v5, %v909_v4  ;;  %v908_v10 = vld [vmem:[%s2844_s9] sm:$0xff] }
 0x12f   :  { %v1165_v35 = vld [vmem:[%s2846_s6] sm:$0xff] }
 0x130   :  { %706 = vmatmul.mubr.f32.gmra.mrb[8].mxu1 %v584_v43  ;;  %v1595_v43 = vpack.c.bf16 %v349_v42, %v347_v41  ;;  %1654 = vmatprep.subr.bf16.mxu1 %v1653_v9  ;;  %v1169_v42 = vld [vmem:[%s2846_s6 + $0x20] sm:$0xff] }
 0x131   :  { %710 = vmatprep.mubr.f32.mxu1 %v587_v29  ;;  %1576 = vmatpush1.bf16.msra.mxu0 %v1575_v13  ;;  %v339_v29 = vld [vmem:[%s2843_s5 + $0xe0] sm:$0xff]  ;;  %v1655_v13 = vpack.c.bf16 %v910_v11, %v908_v10 }
 0x132   :  { %1578 = vmatprep.subr.bf16.mxu0 %v1577_v16  ;;  %v1587_v31 = vpack.c.bf16 %v341_v30, %v339_v29  ;;  %v369_v16 = vld [vmem:[%s2843_s5 + $0x1d0] sm:$0xff]  ;;  %v40_v30 = vld [vmem:[%s2845_s2 + $0x8] sm:$0xff] }
 0x133   :  { %v1615_v17 = vpack.c.bf16 %v369_v16, %v367_v15  ;;  %1656 = vmatpush1.bf16.msra.mxu1 %v1655_v13  ;;  %439 = vmatprep.mubr.f32.mxu0 %v40_v30 }
 0x134   :  { %711 = vmatmul.mubr.f32.gmra.mrb[10].mxu1 %v586_v32  ;;  %v344_v32 = vld [vmem:[%s2843_s5 + $0x108] sm:$0xff] }
 0x135   :  { %715 = vmatprep.mubr.f32.mxu1 %v589_v38  ;;  %1580 = vmatpush1.bf16.msra.mxu0 %v1579_v19  ;;  %v1589_v34 = vpack.c.bf16 %v346_v33, %v344_v32  ;;  %v348_v38 = vld [vmem:[%s2843_s5 + $0x128] sm:$0xff]  ;;  %v915_v19 = vld [vmem:[%s2844_s9 + $0x38] sm:$0xff]  ;;  %v39_v32 = vld [vmem:[%s2845_s2] sm:$0xff] }
 0x136   :  { %1582 = vmatprep.subr.bf16.mxu0 %v1581_v22  ;;  %v1593_v40 = vpack.c.bf16 %v350_v39, %v348_v38  ;;  %v1657_v21 = vpack.c.bf16 %v915_v19, %v913_v18  ;;  %v912_v22 = vld [vmem:[%s2844_s9 + $0x20] sm:$0xff]  ;;  %v1166_v33 = vld [vmem:[%s2846_s6 + $0x8] sm:$0xff]  ;;  %v1172_v39 = vld [vmem:[%s2846_s6 + $0x38] sm:$0xff] }
 0x137   :  { %v1170_v38 = vld [vmem:[%s2846_s6 + $0x28] sm:$0xff] }
 0x138   :  { %716 = vmatmul.mubr.f32.gmra.mrb[12].mxu1 %v588_v45  ;;  %v354_v45 = vld [vmem:[%s2843_s5 + $0x158] sm:$0xff]  ;;  %1658 = vmatprep.subr.bf16.mxu1 %v1657_v21  ;;  %v1665_v41 = vpack.c.bf16 %v1172_v39, %v1170_v38 }
 0x139   :  { %720 = vmatprep.mubr.f32.mxu1 %v591_v46  ;;  %1584 = vmatpush1.bf16.msra.mxu0 %v1583_v25  ;;  %v1597_v46 = vpack.c.bf16 %v354_v45, %v352_v44  ;;  %v1659_v25 = vpack.c.bf16 %v914_v23, %v912_v22  ;;  %v1174_v44 = vld [vmem:[%s2846_s6 + $0x48] sm:$0xff]  ;;  %v1176_v45 = vld [vmem:[%s2846_s6 + $0x58] sm:$0xff] }
 0x13a   :  { %1586 = vmatprep.subr.bf16.mxu0 %v1585_v28  ;;  %v373_v28 = vld [vmem:[%s2843_s5 + $0x1f0] sm:$0xff] }
 0x13b   :  { %v1619_v29 = vpack.c.bf16 %v373_v28, %v371_v27  ;;  %1660 = vmatpush1.bf16.msra.mxu1 %v1659_v25 }
 0x13c   :  { %721 = vmatmul.mubr.f32.gmra.mrb[14].mxu1 %v590_v47  ;;  %v351_v47 = vld [vmem:[%s2843_s5 + $0x140] sm:$0xff] }
 0x13d   :  { %725 = vmatprep.mubr.f32.mxu1 %v593_v50  ;;  %1588 = vmatpush1.bf16.msra.mxu0 %v1587_v31  ;;  %v1599_v49 = vpack.c.bf16 %v353_v48, %v351_v47  ;;  %v356_v50 = vld [vmem:[%s2843_s5 + $0x168] sm:$0xff]  ;;  %v1760_v31 = vmov 0.0   ;;  %v1669_v47 = vpack.c.bf16 %v1176_v45, %v1174_v44  ;;  %v1173_v48 = vld [vmem:[%s2846_s6 + $0x40] sm:$0xff] }
 0x13e   :  { %1590 = vmatprep.subr.bf16.mxu0 %v1589_v34  ;;  %v1168_v34 = vld [vmem:[%s2846_s6 + $0x18] sm:$0xff] }
 0x13f   :  { %v1661_v36 = vpack.c.bf16 %v1168_v34, %v1166_v33 }
 0x140   :  { %726 = vmatmul.mubr.f32.gmra.mrb[16].mxu1 %v592_v51  ;;  %v358_v51 = vld [vmem:[%s2843_s5 + $0x178] sm:$0xff] }
 0x141   :  { %1592 = vmatpush1.bf16.msra.mxu0 %v1591_v37  ;;  %v1601_v52 = vpack.c.bf16 %v358_v51, %v356_v50  ;;  %1004 = vmatprep.mubr.f32.mxu1 %v1760_v31  ;;  %v1167_v37 = vld [vmem:[%s2846_s6 + $0x10] sm:$0xff]  ;;  %v1178_v50 = vld [vmem:[%s2846_s6 + $0x68] sm:$0xff]  ;;  %v1180_v51 = vld [vmem:[%s2846_s6 + $0x78] sm:$0xff] }
 0x142   :  { %1594 = vmatprep.subr.bf16.mxu0 %v1593_v40  ;;  %v1663_v40 = vpack.c.bf16 %v1167_v37, %v1165_v35  ;;  %v1673_v53 = vpack.c.bf16 %v1180_v51, %v1178_v50 }
 0x145   :  { %1596 = vmatpush1.bf16.msra.mxu0 %v1595_v43  ;;  %v1171_v43 = vld [vmem:[%s2846_s6 + $0x30] sm:$0xff] }
 0x146   :  { %1598 = vmatprep.subr.bf16.mxu0 %v1597_v46  ;;  %v1667_v46 = vpack.c.bf16 %v1171_v43, %v1169_v42 }
 0x149   :  { %1600 = vmatpush1.bf16.msra.mxu0 %v1599_v49  ;;  %v1175_v49 = vld [vmem:[%s2846_s6 + $0x50] sm:$0xff] }
 0x14a   :  { %1602 = vmatprep.subr.bf16.mxu0 %v1601_v52  ;;  %v1671_v52 = vpack.c.bf16 %v1175_v49, %v1173_v48 }
 0x14d   :  { %1604 = vmatpush1.bf16.msra.mxu0 %v1603_v55  ;;  %v1179_v55 = vld [vmem:[%s2846_s6 + $0x70] sm:$0xff] }
 0x14e   :  { %1606 = vmatprep.subr.bf16.mxu0 %v1605_v58  ;;  %v1675_v58 = vpack.c.bf16 %v1179_v55, %v1177_v54 }
 0x151   :  { %1608 = vmatpush1.bf16.msra.mxu0 %v1607_v61  ;;  %v1183_v61 = vld [vmem:[%s2846_s6 + $0x90] sm:$0xff] }
 0x152   :  { %1610 = vmatprep.subr.bf16.mxu0 %v1609_v0  ;;  %v1679_v62 = vpack.c.bf16 %v1183_v61, %v1181_v60 }
 0x155   :  { %1612 = vmatpush1.bf16.msra.mxu0 %v1611_v3 }
 0x156   :  { %1614 = vmatprep.subr.bf16.mxu0 %v1613_v14 }
 0x159   :  { %1616 = vmatpush1.bf16.msra.mxu0 %v1615_v17 }
 0x15a   :  { %1618 = vmatprep.subr.bf16.mxu0 %v1617_v26 }
 0x15d   :  { %1620 = vmatpush1.bf16.msra.mxu0 %v1619_v29 }
 0x15e   :  { %1662 = vmatprep.subr.bf16.mxu0 %v1661_v36 }
 0x160   :  { %440 = vmatmul.mubr.f32.vlgmr.msra.gmra.mrb[2].mxu0 %v39_v32 }
 0x161   :  { %1664 = vmatpush1.bf16.msra.mxu0 %v1663_v40 }
 0x162   :  { %1666 = vmatprep.subr.bf16.mxu0 %v1665_v41 }
 0x165   :  { %1668 = vmatpush1.bf16.msra.mxu0 %v1667_v46 }
 0x166   :  { %1670 = vmatprep.subr.bf16.mxu0 %v1669_v47 }
 0x169   :  { %1672 = vmatpush1.bf16.msra.mxu0 %v1671_v52 }
 0x16a   :  { %1674 = vmatprep.subr.bf16.mxu0 %v1673_v53 }
 0x16d   :  { %1676 = vmatpush1.bf16.msra.mxu0 %v1675_v58 }
 0x16e   :  { %1678 = vmatprep.subr.bf16.mxu0 %v1677_v59 }
 0x171   :  { %1680 = vmatpush1.bf16.msra.mxu0 %v1679_v62 }
 0x1f7   :  { %v1405_v63 = vpop.f32.mrb[2].mxu1 }
 0x1f8   :  { %v1406_v0 = vpop.f32.mrb[3].mxu1 }
 0x1f9   :  { %v1407_v1 = vadd.f32 %v1406_v0, %v1405_v63 }
 0x1fb   :  { %v731_v2 = vmul.f32 0.17677669, %v1407_v1  ;;  %v1408_v3 = vpop.f32.mrb[4].mxu1 }
 0x1fc   :  { %v1409_v4 = vpop.f32.mrb[5].mxu1 }
 0x1fd   :  { %v1357_v5 = vclamps-f32 %v731_v2, 5.0  ;;  %v1410_v6 = vadd.f32 %v1409_v4, %v1408_v3 }
 0x1ff   :  { %v756_v9 = vsel %vm755_vm0, %v1357_v5, -inf  ;;  %v732_v10 = vmul.f32 0.17677669, %v1410_v6  ;;  %v1411_v11 = vpop.f32.mrb[6].mxu1 }
 0x200   :  { %v757_v12 = vrot.slane %v756_v9, 4  ;;  %v1412_v13 = vpop.f32.mrb[7].mxu1 }
 0x201   :  { %v1358_v14 = vclamps-f32 %v732_v10, 5.0  ;;  %v1413_v15 = vadd.f32 %v1412_v13, %v1411_v11 }
 0x202   :  { %v758_v16 = vmax.f32 %v756_v9, %v757_v12 }
 0x203   :  { %v763_v17 = vsel %vm755_vm0, %v1358_v14, -inf  ;;  %v733_v18 = vmul.f32 0.17677669, %v1413_v15  ;;  %v1414_v19 = vpop.f32.mrb[8].mxu1 }
 0x204   :  { %v759_v20 = vrot.slane %v758_v16, 2  ;;  %v764_v21 = vrot.slane %v763_v17, 4  ;;  %v1415_v22 = vpop.f32.mrb[9].mxu1 }
 0x205   :  { %v1359_v23 = vclamps-f32 %v733_v18, 5.0  ;;  %v1416_v24 = vadd.f32 %v1415_v22, %v1414_v19 }
 0x206   :  { %v760_v25 = vmax.f32 %v758_v16, %v759_v20  ;;  %v765_v26 = vmax.f32 %v763_v17, %v764_v21 }
 0x207   :  { %v770_v27 = vsel %vm755_vm0, %v1359_v23, -inf  ;;  %v734_v28 = vmul.f32 0.17677669, %v1416_v24  ;;  %v1417_v29 = vpop.f32.mrb[10].mxu1 }
 0x208   :  { %v761_v30 = vrot.slane %v760_v25, 1  ;;  %v766_v32 = vrot.slane %v765_v26, 2  ;;  %v771_v33 = vrot.slane %v770_v27, 4  ;;  %v1418_v34 = vpop.f32.mrb[11].mxu1 }
 0x209   :  { %v1360_v35 = vclamps-f32 %v734_v28, 5.0  ;;  %v1419_v36 = vadd.f32 %v1418_v34, %v1417_v29 }
 0x20a   :  { %v762_v37 = vmax.f32 %v760_v25, %v761_v30  ;;  %v767_v38 = vmax.f32 %v765_v26, %v766_v32  ;;  %v772_v39 = vmax.f32 %v770_v27, %v771_v33 }
 0x20b   :  { %v777_v40 = vsel %vm755_vm0, %v1360_v35, -inf  ;;  %v2615_v41 = vmul.f32 0.17677669, %v1419_v36  ;;  %v1420_v42 = vpop.f32.mrb[12].mxu1 }
 0x20c   :  { %v812_v43 = vsub.f32 %v1357_v5, %v762_v37  ;;  %v768_v44 = vrot.slane %v767_v38, 1  ;;  %v773_v45 = vrot.slane %v772_v39, 2  ;;  %v778_v46 = vrot.slane %v777_v40, 4  ;;  %v1421_v47 = vpop.f32.mrb[13].mxu1 }
 0x20d   :  { %v1361_v48 = vclamps-f32 %v2615_v41, 5.0  ;;  %v1422_v49 = vadd.f32 %v1421_v47, %v1420_v42 }
 0x20e   :  { %v820_v50 = vmul.f32 1.442695, %v812_v43  ;;  %v769_v51 = vmax.f32 %v767_v38, %v768_v44  ;;  %v774_v52 = vmax.f32 %v772_v39, %v773_v45  ;;  %v779_v53 = vmax.f32 %v777_v40, %v778_v46 }
 0x20f   :  { %v784_v54 = vsel %vm755_vm0, %v1361_v48, -inf  ;;  %v736_v55 = vmul.f32 0.17677669, %v1422_v49  ;;  %v1423_v56 = vpop.f32.mrb[14].mxu1 }
 0x210   :  { %1727 = vpow2.f32 %v820_v50  ;;  %v813_v57 = vsub.f32 %v1358_v14, %v769_v51  ;;  %v775_v58 = vrot.slane %v774_v52, 1  ;;  %v780_v59 = vrot.slane %v779_v53, 2  ;;  %v1424_v60 = vpop.f32.mrb[15].mxu1 }
 0x211   :  { %v785_v61 = vrot.slane %v784_v54, 4  ;;  %v1362_v62 = vclamps-f32 %v736_v55, 5.0  ;;  %v1425_v63 = vadd.f32 %v1424_v60, %v1423_v56 }
 0x212   :  { %v822_v0 = vmul.f32 1.442695, %v813_v57  ;;  %v776_v1 = vmax.f32 %v774_v52, %v775_v58  ;;  %v781_v2 = vmax.f32 %v779_v53, %v780_v59 }
 0x213   :  { %v786_v3 = vmax.f32 %v784_v54, %v785_v61  ;;  %v791_v4 = vsel %vm755_vm0, %v1362_v62, -inf  ;;  %v737_v5 = vmul.f32 0.17677669, %v1425_v63  ;;  %v1426_v6 = vpop.f32.mrb[16].mxu1 }
 0x214   :  { %1729 = vpow2.f32 %v822_v0  ;;  %v814_v9 = vsub.f32 %v1359_v23, %v776_v1  ;;  %v782_v10 = vrot.slane %v781_v2, 1  ;;  %v792_v11 = vrot.slane %v791_v4, 4  ;;  %v1427_v12 = vpop.f32.mrb[17].mxu1 }
 0x215   :  { %v787_v13 = vrot.slane %v786_v3, 2  ;;  %v1363_v14 = vclamps-f32 %v737_v5, 5.0  ;;  %v1428_v15 = vadd.f32 %v1427_v12, %v1426_v6 }
 0x216   :  { %v824_v16 = vmul.f32 1.442695, %v814_v9  ;;  %v783_v17 = vmax.f32 %v781_v2, %v782_v10  ;;  %v793_v18 = vmax.f32 %v791_v4, %v792_v11 }
 0x217   :  { %v788_v19 = vmax.f32 %v786_v3, %v787_v13  ;;  %v798_v20 = vsel %vm755_vm0, %v1363_v14, -inf  ;;  %v738_v21 = vmul.f32 0.17677669, %v1428_v15 }
 0x218   :  { %1731 = vpow2.f32 %v824_v16  ;;  %v815_v22 = vsub.f32 %v1360_v35, %v783_v17  ;;  %v794_v24 = vrot.slane %v793_v18, 2  ;;  %v799_v25 = vrot.slane %v798_v20, 4 }
 0x219   :  { %v789_v26 = vrot.slane %v788_v19, 1  ;;  %v1364_v27 = vclamps-f32 %v738_v21, 5.0 }
 0x21a   :  { %v2621_v23 = vpop.eup %1727  ;;  %v826_v28 = vmul.f32 1.442695, %v815_v22  ;;  %v795_v29 = vmax.f32 %v793_v18, %v794_v24  ;;  %v800_v30 = vmax.f32 %v798_v20, %v799_v25 }
 0x21b   :  { %v836_v32 = vsel %vm755_vm0, %v2621_v23, 0.0  ;;  %v790_v33 = vmax.f32 %v788_v19, %v789_v26  ;;  %v805_v34 = vsel %vm755_vm0, %v1364_v27, -inf }
 0x21c   :  { %v837_v36 = vrot.slane %v836_v32, 4  ;;  %1733 = vpow2.f32 %v826_v28  ;;  %v796_v37 = vrot.slane %v795_v29, 1  ;;  %v801_v38 = vrot.slane %v800_v30, 2 }
 0x21d   :  { %v816_v35 = vsub.f32 %v1361_v48, %v790_v33  ;;  %v806_v39 = vrot.slane %v805_v34, 4 }
 0x21e   :  { %v2626_v40 = vpop.eup %1729  ;;  %v838_v41 = vadd.f32 %v837_v36, %v836_v32  ;;  %v797_v42 = vmax.f32 %v795_v29, %v796_v37  ;;  %v802_v43 = vmax.f32 %v800_v30, %v801_v38 }
 0x21f   :  { %v843_v44 = vsel %vm755_vm0, %v2626_v40, 0.0  ;;  %v828_v45 = vmul.f32 1.442695, %v816_v35  ;;  %v807_v46 = vmax.f32 %v805_v34, %v806_v39 }
 0x220   :  { %v839_v47 = vrot.slane %v838_v41, 2  ;;  %v844_v49 = vrot.slane %v843_v44, 4  ;;  %v817_v50 = vsub.f32 %v1362_v62, %v797_v42  ;;  %v803_v51 = vrot.slane %v802_v43, 1 }
 0x221   :  { %1735 = vpow2.f32 %v828_v45  ;;  %v808_v52 = vrot.slane %v807_v46, 2 }
 0x222   :  { %v2630_v53 = vpop.eup %1731  ;;  %v840_v48 = vadd.f32 %v839_v47, %v838_v41  ;;  %v845_v54 = vadd.f32 %v844_v49, %v843_v44  ;;  %v830_v55 = vmul.f32 1.442695, %v817_v50  ;;  %v804_v56 = vmax.f32 %v802_v43, %v803_v51 }
 0x223   :  { %v850_v57 = vsel %vm755_vm0, %v2630_v53, 0.0  ;;  %v809_v58 = vmax.f32 %v807_v46, %v808_v52 }
 0x224   :  { %v841_v59 = vrot.slane %v840_v48, 1  ;;  %v846_v60 = vrot.slane %v845_v54, 2  ;;  %v851_v61 = vrot.slane %v850_v57, 4  ;;  %1737 = vpow2.f32 %v830_v55 }
 0x225   :  { %v818_v63 = vsub.f32 %v1363_v14, %v804_v56  ;;  %v810_v0 = vrot.slane %v809_v58, 1 }
 0x226   :  { %v2634_v62 = vpop.eup %1733  ;;  %v842_v1 = vadd.f32 %v841_v59, %v840_v48  ;;  %v847_v2 = vadd.f32 %v846_v60, %v845_v54  ;;  %v852_v3 = vadd.f32 %v851_v61, %v850_v57 }
 0x227   :  { %v857_v4 = vsel %vm755_vm0, %v2634_v62, 0.0  ;;  %v832_v5 = vmul.f32 1.442695, %v818_v63  ;;  %v811_v6 = vmax.f32 %v809_v58, %v810_v0 }
 0x228   :  { %1739 = vrcp.f32 %v842_v1  ;;  %v848_v9 = vrot.slane %v847_v2, 1  ;;  %v853_v10 = vrot.slane %v852_v3, 2  ;;  %v858_v11 = vrot.slane %v857_v4, 4 }
 0x229   :  { %1741 = vpow2.f32 %v832_v5  ;;  %v819_v12 = vsub.f32 %v1364_v27, %v811_v6 }
 0x22a   :  { %v854_v13 = vadd.f32 %v853_v10, %v852_v3  ;;  %v859_v15 = vadd.f32 %v858_v11, %v857_v4  ;;  %v849_v14 = vadd.f32 %v848_v9, %v847_v2  ;;  %v1186_v10 = vld [vmem:[%s2846_s6 + $0xa8] sm:$0xff]  ;;  %v1188_v11 = vld [vmem:[%s2846_s6 + $0xb8] sm:$0xff] }
 0x22b   :  { %v2638_v16 = vpop.eup %1735  ;;  %v834_v17 = vmul.f32 1.442695, %v819_v12  ;;  %v1681_v12 = vpack.c.bf16 %v1188_v11, %v1186_v10  ;;  %v1226_v10 = vld [vmem:[%s2846_s6 + $0x1e8] sm:$0xff]  ;;  %v1228_v11 = vld [vmem:[%s2846_s6 + $0x1f8] sm:$0xff] }
 0x22c   :  { %v855_v18 = vrot.slane %v854_v13, 1  ;;  %v860_v19 = vrot.slane %v859_v15, 2  ;;  %v864_v20 = vsel %vm755_vm0, %v2638_v16, 0.0  ;;  %1743 = vrcp.f32 %v849_v14 }
 0x22d   :  { %v865_v21 = vrot.slane %v864_v20, 4  ;;  %1745 = vpow2.f32 %v834_v17  ;;  %1682 = vmatprep.subr.bf16.mxu0 %v1681_v12  ;;  %v1190_v17 = vld [vmem:[%s2846_s6 + $0xc8] sm:$0xff]  ;;  %v1225_v12 = vld [vmem:[%s2846_s6 + $0x1e0] sm:$0xff] }
 0x22e   :  { %v1738_v22 = vpop.eup %1737  ;;  %v861_v24 = vadd.f32 %v860_v19, %v859_v15  ;;  %v856_v25 = vadd.f32 %v855_v18, %v854_v13  ;;  %v1185_v13 = vld [vmem:[%s2846_s6 + $0xa0] sm:$0xff]  ;;  %v1192_v18 = vld [vmem:[%s2846_s6 + $0xd8] sm:$0xff] }
 0x22f   :  { %v866_v26 = vadd.f32 %v865_v21, %v864_v20  ;;  %v871_v27 = vsel %vm755_vm0, %v1738_v22, 0.0  ;;  %v1685_v19 = vpack.c.bf16 %v1192_v18, %v1190_v17  ;;  %v1189_v20 = vld [vmem:[%s2846_s6 + $0xc0] sm:$0xff]  ;;  %v1191_v21 = vld [vmem:[%s2846_s6 + $0xd0] sm:$0xff] }
 0x230   :  { %v862_v28 = vrot.slane %v861_v24, 1  ;;  %v872_v29 = vrot.slane %v871_v27, 4  ;;  %1747 = vrcp.f32 %v856_v25  ;;  %v1196_v25 = vld [vmem:[%s2846_s6 + $0xf8] sm:$0xff] }
 0x231   :  { %v867_v30 = vrot.slane %v866_v26, 2 }
 0x232   :  { %v1740_v32 = vpop.eup %1739  ;;  %v873_v33 = vadd.f32 %v872_v29, %v871_v27  ;;  %v863_v34 = vadd.f32 %v862_v28, %v861_v24  ;;  %v1194_v24 = vld [vmem:[%s2846_s6 + $0xe8] sm:$0xff]  ;;  %v1193_v27 = vld [vmem:[%s2846_s6 + $0xe0] sm:$0xff]  ;;  %v1195_v28 = vld [vmem:[%s2846_s6 + $0xf0] sm:$0xff] }
 0x233   :  { %v1742_v36 = vpop.eup %1741  ;;  %v893_v37 = vmul.f32 %v1740_v32, %v2621_v23  ;;  %v868_v38 = vadd.f32 %v867_v30, %v866_v26  ;;  %v2677_v15 = vpop.f32.mrb[2].mxu0  ;;  %v1689_v26 = vpack.c.bf16 %v1196_v25, %v1194_v24  ;;  %v1691_v29 = vpack.c.bf16 %v1195_v28, %v1193_v27  ;;  %v1198_v30 = vld [vmem:[%s2846_s6 + $0x108] sm:$0xff]  ;;  %v1200_v32 = vld [vmem:[%s2846_s6 + $0x118] sm:$0xff] }
 0x234   :  { %v874_v35 = vrot.slane %v873_v33, 2  ;;  %v878_v39 = vsel %vm755_vm0, %v1742_v36, 0.0  ;;  %1749 = vrcp.f32 %v863_v34  ;;  %v1197_v34 = vld [vmem:[%s2846_s6 + $0x100] sm:$0xff] }
 0x235   :  { %v869_v41 = vrot.slane %v868_v38, 1  ;;  %v879_v42 = vrot.slane %v878_v39, 4  ;;  %1365 = vmatmul.mubr.msk.f32.vlgmr.msra.gmra.mrb[18].mxu1 %vm755_vm0, %v893_v37 }
 0x236   :  { %v1744_v43 = vpop.eup %1743  ;;  %v875_v44 = vadd.f32 %v874_v35, %v873_v33  ;;  %1010 = vmatprep.mubr.f32.mxu1 %v1760_v31  ;;  %v1693_v33 = vpack.c.bf16 %v1200_v32, %v1198_v30  ;;  %v1204_v35 = vld [vmem:[%s2846_s6 + $0x138] sm:$0xff] }
 0x237   :  { %v1746_v45 = vpop.eup %1745  ;;  %v880_v46 = vadd.f32 %v879_v42, %v878_v39  ;;  %v895_v47 = vmul.f32 %v1744_v43, %v2626_v40  ;;  %v870_v49 = vadd.f32 %v869_v41, %v868_v38  ;;  %v1202_v38 = vld [vmem:[%s2846_s6 + $0x128] sm:$0xff]  ;;  %v1201_v41 = vld [vmem:[%s2846_s6 + $0x120] sm:$0xff]  ;;  %v1203_v42 = vld [vmem:[%s2846_s6 + $0x130] sm:$0xff] }
 0x238   :  { %v876_v50 = vrot.slane %v875_v44, 1  ;;  %v885_v23 = vsel %vm755_vm0, %v1746_v45, 0.0  ;;  %v1697_v39 = vpack.c.bf16 %v1204_v35, %v1202_v38  ;;  %v1699_v43 = vpack.c.bf16 %v1203_v42, %v1201_v41 }
 0x239   :  { %v881_v51 = vrot.slane %v880_v46, 2  ;;  %v886_v52 = vrot.slane %v885_v23, 4  ;;  %1366 = vmatmul.mubr.msk.f32.gmra.mrb[20].mxu1 %vm755_vm0, %v895_v47  ;;  %1751 = vrcp.f32 %v870_v49  ;;  %v1205_v47 = vld [vmem:[%s2846_s6 + $0x140] sm:$0xff]  ;;  %v1207_v49 = vld [vmem:[%s2846_s6 + $0x150] sm:$0xff] }
 0x23a   :  { %v1748_v48 = vpop.eup %1747  ;;  %1016 = vmatprep.mubr.f32.mxu1 %v1760_v31  ;;  %v877_v54 = vadd.f32 %v876_v50, %v875_v44  ;;  %v1206_v44 = vld [vmem:[%s2846_s6 + $0x148] sm:$0xff]  ;;  %v1703_v50 = vpack.c.bf16 %v1207_v49, %v1205_v47 }
 0x23b   :  { %v882_v55 = vadd.f32 %v881_v51, %v880_v46  ;;  %v887_v56 = vadd.f32 %v886_v52, %v885_v23  ;;  %v897_v57 = vmul.f32 %v1748_v48, %v2630_v53  ;;  %v1210_v23 = vld [vmem:[%s2846_s6 + $0x168] sm:$0xff]  ;;  %v1212_v51 = vld [vmem:[%s2846_s6 + $0x178] sm:$0xff]  ;;  %v1209_v48 = vld [vmem:[%s2846_s6 + $0x160] sm:$0xff] }
 0x23c   :  { %1753 = vrcp.f32 %v877_v54  ;;  %v1705_v52 = vpack.c.bf16 %v1212_v51, %v1210_v23  ;;  %v1211_v54 = vld [vmem:[%s2846_s6 + $0x170] sm:$0xff] }
 0x23d   :  { %v883_v58 = vrot.slane %v882_v55, 1  ;;  %v888_v40 = vrot.slane %v887_v56, 2  ;;  %1367 = vmatmul.mubr.msk.f32.gmra.mrb[22].mxu1 %vm755_vm0, %v897_v57  ;;  %v1216_v57 = vld [vmem:[%s2846_s6 + $0x198] sm:$0xff] }
 0x23e   :  { %v1750_v59 = vpop.eup %1749  ;;  %1022 = vmatprep.mubr.f32.mxu1 %v1760_v31 }
 0x23f   :  { %v889_v60 = vadd.f32 %v888_v40, %v887_v56  ;;  %v899_v61 = vmul.f32 %v1750_v59, %v2634_v62  ;;  %v884_v63 = vadd.f32 %v883_v58, %v882_v55  ;;  %v1707_v55 = vpack.c.bf16 %v1211_v54, %v1209_v48  ;;  %v1214_v56 = vld [vmem:[%s2846_s6 + $0x188] sm:$0xff]  ;;  %v1213_v40 = vld [vmem:[%s2846_s6 + $0x180] sm:$0xff]  ;;  %v1215_v59 = vld [vmem:[%s2846_s6 + $0x190] sm:$0xff] }
 0x240   :  { %v1709_v58 = vpack.c.bf16 %v1216_v57, %v1214_v56 }
 0x241   :  { %v890_v0 = vrot.slane %v889_v60, 1  ;;  %1368 = vmatmul.mubr.msk.f32.gmra.mrb[24].mxu1 %vm755_vm0, %v899_v61  ;;  %1755 = vrcp.f32 %v884_v63  ;;  %v1218_v61 = vld [vmem:[%s2846_s6 + $0x1a8] sm:$0xff]  ;;  %v1220_v63 = vld [vmem:[%s2846_s6 + $0x1b8] sm:$0xff] }
 0x242   :  { %1028 = vmatprep.mubr.f32.mxu1 %v1760_v31 }
 0x243   :  { %v1752_v1 = vpop.eup %1751  ;;  %v891_v53 = vadd.f32 %v890_v0, %v889_v60  ;;  %v1711_v60 = vpack.c.bf16 %v1215_v59, %v1213_v40  ;;  %v1713_v0 = vpack.c.bf16 %v1220_v63, %v1218_v61 }
 0x244   :  { %v901_v2 = vmul.f32 %v1752_v1, %v2638_v16  ;;  %v2679_v16 = vpop.f32.mrb[3].mxu0  ;;  %v1217_v1 = vld [vmem:[%s2846_s6 + $0x1a0] sm:$0xff] }
 0x245   :  { %1757 = vrcp.f32 %v891_v53  ;;  %v1219_v53 = vld [vmem:[%s2846_s6 + $0x1b0] sm:$0xff] }
 0x246   :  { %v1754_v3 = vpop.eup %1753  ;;  %1369 = vmatmul.mubr.msk.f32.gmra.mrb[26].mxu1 %vm755_vm0, %v901_v2  ;;  %v1715_v2 = vpack.c.bf16 %v1219_v53, %v1217_v1 }
 0x247   :  { %1034 = vmatprep.mubr.f32.mxu1 %v1760_v31  ;;  %v903_v4 = vmul.f32 %v1754_v3, %v1738_v22  ;;  %v1687_v22 = vpack.c.bf16 %v1191_v21, %v1189_v20  ;;  %v1222_v3 = vld [vmem:[%s2846_s6 + $0x1c8] sm:$0xff] }
 0x24a   :  { %1370 = vmatmul.mubr.msk.f32.gmra.mrb[28].mxu1 %vm755_vm0, %v903_v4  ;;  %v1224_v4 = vld [vmem:[%s2846_s6 + $0x1d8] sm:$0xff] }
 0x24b   :  { %v1756_v62 = vpop.eup %1755  ;;  %1040 = vmatprep.mubr.f32.mxu1 %v1760_v31 }
 0x24c   :  { %v905_v5 = vmul.f32 %v1756_v62, %v1742_v36  ;;  %v1199_v36 = vld [vmem:[%s2846_s6 + $0x110] sm:$0xff]  ;;  %v1717_v62 = vpack.c.bf16 %v1224_v4, %v1222_v3 }
 0x24d   :  { %v1695_v37 = vpack.c.bf16 %v1199_v36, %v1197_v34 }
 0x24e   :  { %1371 = vmatmul.mubr.msk.f32.gmra.mrb[30].mxu1 %vm755_vm0, %v905_v5  ;;  %v1221_v5 = vld [vmem:[%s2846_s6 + $0x1c0] sm:$0xff] }
 0x24f   :  { %v1758_v6 = vpop.eup %1757  ;;  %1046 = vmatprep.mubr.f32.mxu1 %v1760_v31  ;;  %v1187_v31 = vld [vmem:[%s2846_s6 + $0xb0] sm:$0xff] }
 0x250   :  { %v907_v9 = vmul.f32 %v1758_v6, %v1746_v45  ;;  %v1683_v14 = vpack.c.bf16 %v1187_v31, %v1185_v13  ;;  %v1208_v45 = vld [vmem:[%s2846_s6 + $0x158] sm:$0xff]  ;;  %v1223_v6 = vld [vmem:[%s2846_s6 + $0x1d0] sm:$0xff]  ;;  %v1721_v13 = vpack.c.bf16 %v1228_v11, %v1226_v10 }
 0x251   :  { %v1701_v46 = vpack.c.bf16 %v1208_v45, %v1206_v44  ;;  %v1227_v31 = vld [vmem:[%s2846_s6 + $0x1f0] sm:$0xff] }
 0x252   :  { %1372 = vmatmul.mubr.msk.f32.gmra.mrb[32].mxu1 %vm755_vm0, %v907_v9  ;;  %1684 = vmatpush1.bf16.msra.mxu0 %v1683_v14  ;;  %v1719_v9 = vpack.c.bf16 %v1223_v6, %v1221_v5  ;;  %v1723_v14 = vpack.c.bf16 %v1227_v31, %v1225_v12 }
 0x253   :  { %1686 = vmatprep.subr.bf16.mxu0 %v1685_v19 }
 0x256   :  { %1688 = vmatpush1.bf16.msra.mxu0 %v1687_v22 }
 0x257   :  { %1690 = vmatprep.subr.bf16.mxu0 %v1689_v26 }
 0x25a   :  { %1692 = vmatpush1.bf16.msra.mxu0 %v1691_v29 }
 0x25b   :  { %1694 = vmatprep.subr.bf16.mxu0 %v1693_v33 }
 0x25e   :  { %1696 = vmatpush1.bf16.msra.mxu0 %v1695_v37 }
 0x25f   :  { %1698 = vmatprep.subr.bf16.mxu0 %v1697_v39 }
 0x262   :  { %1700 = vmatpush1.bf16.msra.mxu0 %v1699_v43 }
 0x263   :  { %1702 = vmatprep.subr.bf16.mxu0 %v1701_v46 }
 0x266   :  { %1704 = vmatpush1.bf16.msra.mxu0 %v1703_v50 }
 0x267   :  { %1706 = vmatprep.subr.bf16.mxu0 %v1705_v52 }
 0x26a   :  { %1708 = vmatpush1.bf16.msra.mxu0 %v1707_v55 }
 0x26b   :  { %1710 = vmatprep.subr.bf16.mxu0 %v1709_v58 }
 0x26e   :  { %1712 = vmatpush1.bf16.msra.mxu0 %v1711_v60 }
 0x26f   :  { %1714 = vmatprep.subr.bf16.mxu0 %v1713_v0 }
 0x272   :  { %1716 = vmatpush1.bf16.msra.mxu0 %v1715_v2 }
 0x273   :  { %1718 = vmatprep.subr.bf16.mxu0 %v1717_v62 }
 0x276   :  { %1720 = vmatpush1.bf16.msra.mxu0 %v1719_v9 }
 0x277   :  { %1722 = vmatprep.subr.bf16.mxu0 %v1721_v13 }
 0x27a   :  { %1724 = vmatpush1.bf16.msra.mxu0 %v1723_v14 }
 0x308   :  { %v1006_v17 = vpop.f32.mrb[18].mxu1 }
 0x309   :  { %v1053_v18 = vmul.f32 %v1006_v17, %v2677_v15  ;;  %v1008_v19 = vpop.f32.mrb[19].mxu1 }
 0x30a   :  { %v1054_v20 = vmul.f32 %v1008_v19, %v2679_v16 }
 0x30b   :  { %v1069_v21 = vrot.slane %v1053_v18, 4 }
 0x30c   :  { %v1075_v22 = vrot.slane %v1054_v20, 4  ;;  %v1012_v24 = vpop.f32.mrb[20].mxu1 }
 0x30d   :  { %v1070_v25 = vadd.f32 %v1069_v21, %v1053_v18  ;;  %v1055_v26 = vmul.f32 %v1012_v24, %v2677_v15  ;;  %v1014_v27 = vpop.f32.mrb[21].mxu1 }
 0x30e   :  { %v1076_v28 = vadd.f32 %v1075_v22, %v1054_v20  ;;  %v1056_v29 = vmul.f32 %v1014_v27, %v2679_v16 }
 0x30f   :  { %v1071_v30 = vrot.slane %v1070_v25, 2  ;;  %v1081_v32 = vrot.slane %v1055_v26, 4 }
 0x310   :  { %v1077_v33 = vrot.slane %v1076_v28, 2  ;;  %v1087_v34 = vrot.slane %v1056_v29, 4  ;;  %v1018_v36 = vpop.f32.mrb[22].mxu1 }
 0x311   :  { %v1072_v37 = vadd.f32 %v1071_v30, %v1070_v25  ;;  %v1082_v38 = vadd.f32 %v1081_v32, %v1055_v26  ;;  %v1057_v35 = vmul.f32 %v1018_v36, %v2677_v15  ;;  %v1020_v39 = vpop.f32.mrb[23].mxu1 }
 0x312   :  { %v1078_v41 = vadd.f32 %v1077_v33, %v1076_v28  ;;  %v1088_v42 = vadd.f32 %v1087_v34, %v1056_v29  ;;  %v1058_v43 = vmul.f32 %v1020_v39, %v2679_v16 }
 0x313   :  { %v1083_v44 = vrot.slane %v1082_v38, 2  ;;  %v1093_v45 = vrot.slane %v1057_v35, 4  ;;  %v1073_v46 = vrot.slane %v1072_v37, 1 }
 0x314   :  { %v1089_v47 = vrot.slane %v1088_v42, 2  ;;  %v1099_v49 = vrot.slane %v1058_v43, 4  ;;  %v1024_v50 = vpop.f32.mrb[24].mxu1  ;;  %v1079_v23 = vrot.slane %v1078_v41, 1 }
 0x315   :  { %v1084_v51 = vadd.f32 %v1083_v44, %v1082_v38  ;;  %v1094_v52 = vadd.f32 %v1093_v45, %v1057_v35  ;;  %v1059_v48 = vmul.f32 %v1024_v50, %v2677_v15  ;;  %v1026_v54 = vpop.f32.mrb[25].mxu1  ;;  %v1074_v60 = vadd.f32 %v1073_v46, %v1072_v37 }
 0x316   :  { %v1090_v55 = vadd.f32 %v1089_v47, %v1088_v42  ;;  %v1100_v56 = vadd.f32 %v1099_v49, %v1058_v43  ;;  %v1060_v57 = vmul.f32 %v1026_v54, %v2679_v16  ;;  %v1080_v1 = vadd.f32 %v1079_v23, %v1078_v41 }
 0x317   :  { %v1085_v58 = vrot.slane %v1084_v51, 1  ;;  %v1095_v40 = vrot.slane %v1094_v52, 2  ;;  %v1105_v59 = vrot.slane %v1059_v48, 4 }
 0x318   :  { %v1091_v61 = vrot.slane %v1090_v55, 1  ;;  %v1101_v63 = vrot.slane %v1100_v56, 2  ;;  %v1111_v0 = vrot.slane %v1060_v57, 4 }
 0x319   :  { %v1086_v53 = vadd.f32 %v1085_v58, %v1084_v51  ;;  %v1096_v2 = vadd.f32 %v1095_v40, %v1094_v52  ;;  %v1106_v3 = vadd.f32 %v1105_v59, %v1059_v48  ;;  %v1030_v4 = vpop.f32.mrb[26].mxu1 }
 0x31a   :  { %v1092_v62 = vadd.f32 %v1091_v61, %v1090_v55  ;;  %v1102_v5 = vadd.f32 %v1101_v63, %v1100_v56  ;;  %v1112_v6 = vadd.f32 %v1111_v0, %v1060_v57  ;;  %v1061_v9 = vmul.f32 %v1030_v4, %v2677_v15  ;;  %v1032_v10 = vpop.f32.mrb[27].mxu1 }
 0x31b   :  { %v1258_v11 = vsel %vm1257_vm1, %v1086_v53, %v1074_v60  ;;  %v1097_v12 = vrot.slane %v1096_v2, 1  ;;  %v1107_v13 = vrot.slane %v1106_v3, 2  ;;  %v1062_v31 = vmul.f32 %v1032_v10, %v2679_v16 }
 0x31c   :  { %v1271_v14 = vsel %vm1257_vm1, %v1092_v62, %v1080_v1  ;;  %v1103_v17 = vrot.slane %v1102_v5, 1  ;;  %v1113_v18 = vrot.slane %v1112_v6, 2  ;;  %v1117_v19 = vrot.slane %v1061_v9, 4 }
 0x31d   :  { %v1098_v20 = vadd.f32 %v1097_v12, %v1096_v2  ;;  %v1108_v21 = vadd.f32 %v1107_v13, %v1106_v3  ;;  %v1123_v22 = vrot.slane %v1062_v31, 4  ;;  %v1036_v24 = vpop.f32.mrb[28].mxu1 }
 0x31e   :  { %v1104_v25 = vadd.f32 %v1103_v17, %v1102_v5  ;;  %v1114_v26 = vadd.f32 %v1113_v18, %v1112_v6  ;;  %v1118_v27 = vadd.f32 %v1117_v19, %v1061_v9  ;;  %v1063_v28 = vmul.f32 %v1036_v24, %v2677_v15  ;;  %v1038_v29 = vpop.f32.mrb[29].mxu1 }
 0x31f   :  { %v1260_v30 = vsel %vm1259_vm2, %v1098_v20, %v1258_v11  ;;  %v1109_v32 = vrot.slane %v1108_v21, 1  ;;  %v1124_v33 = vadd.f32 %v1123_v22, %v1062_v31  ;;  %v1064_v34 = vmul.f32 %v1038_v29, %v2679_v16 }
 0x320   :  { %v1272_v36 = vsel %vm1259_vm2, %v1104_v25, %v1271_v14  ;;  %v1115_v37 = vrot.slane %v1114_v26, 1  ;;  %v1119_v38 = vrot.slane %v1118_v27, 2  ;;  %v1129_v35 = vrot.slane %v1063_v28, 4 }
 0x321   :  { %v1110_v39 = vadd.f32 %v1109_v32, %v1108_v21  ;;  %v1125_v41 = vrot.slane %v1124_v33, 2  ;;  %v1135_v42 = vrot.slane %v1064_v34, 4  ;;  %v1042_v43 = vpop.f32.mrb[30].mxu1 }
 0x322   :  { %v1116_v44 = vadd.f32 %v1115_v37, %v1114_v26  ;;  %v1120_v45 = vadd.f32 %v1119_v38, %v1118_v27  ;;  %v1130_v46 = vadd.f32 %v1129_v35, %v1063_v28  ;;  %v1065_v47 = vmul.f32 %v1042_v43, %v2677_v15  ;;  %v1044_v49 = vpop.f32.mrb[31].mxu1 }
 0x323   :  { %v1262_v50 = vsel %vm1261_vm3, %v1110_v39, %v1260_v30  ;;  %v1126_v23 = vadd.f32 %v1125_v41, %v1124_v33  ;;  %v1136_v51 = vadd.f32 %v1135_v42, %v1064_v34  ;;  %v1066_v52 = vmul.f32 %v1044_v49, %v2679_v16  ;;  %v1229_v39 = vld [vmem:[%s2847_s7] sm:$0x3] }
 0x324   :  { %v1121_v48 = vrot.slane %v1120_v45, 1  ;;  %v1131_v54 = vrot.slane %v1130_v46, 2  ;;  %v1141_v55 = vrot.slane %v1065_v47, 4  ;;  %v1273_v56 = vsel %vm1261_vm3, %v1116_v44, %v1272_v36 }
 0x325   :  { %v1127_v57 = vrot.slane %v1126_v23, 1  ;;  %v1137_v58 = vrot.slane %v1136_v51, 2  ;;  %v1147_v40 = vrot.slane %v1066_v52, 4  ;;  %v1048_v59 = vpop.f32.mrb[32].mxu1  ;;  %v1234_v41 = vrot.slane %v1229_v39, %v2320_v7 }
 0x326   :  { %v1122_v60 = vadd.f32 %v1121_v48, %v1120_v45  ;;  %v1132_v61 = vadd.f32 %v1131_v54, %v1130_v46  ;;  %v1142_v63 = vadd.f32 %v1141_v55, %v1065_v47  ;;  %v1067_v0 = vmul.f32 %v1048_v59, %v2677_v15  ;;  %v1050_v1 = vpop.f32.mrb[33].mxu1 }
 0x327   :  { %v1128_v53 = vadd.f32 %v1127_v57, %v1126_v23  ;;  %v1138_v2 = vadd.f32 %v1137_v58, %v1136_v51  ;;  %v1148_v3 = vadd.f32 %v1147_v40, %v1066_v52  ;;  %v1068_v4 = vmul.f32 %v1050_v1, %v2679_v16 }
 0x328   :  { %v1133_v62 = vrot.slane %v1132_v61, 1  ;;  %v1143_v5 = vrot.slane %v1142_v63, 2  ;;  %v1153_v6 = vrot.slane %v1067_v0, 4  ;;  %v1264_v9 = vsel %vm1263_vm4, %v1122_v60, %v1262_v50 }
 0x329   :  { %v1139_v10 = vrot.slane %v1138_v2, 1  ;;  %v1149_v11 = vrot.slane %v1148_v3, 2  ;;  %v1159_v12 = vrot.slane %v1068_v4, 4  ;;  %v1274_v13 = vsel %vm1263_vm4, %v1128_v53, %v1273_v56 }
 0x32a   :  { %v1134_v31 = vadd.f32 %v1133_v62, %v1132_v61  ;;  %v1144_v14 = vadd.f32 %v1143_v5, %v1142_v63  ;;  %v1154_v17 = vadd.f32 %v1153_v6, %v1067_v0  ;;  %v1238_v42 = vrot.slane %v1229_v39, %v2322_v8 }
 0x32b   :  { %v1140_v15 = vadd.f32 %v1139_v10, %v1138_v2  ;;  %v1150_v18 = vadd.f32 %v1149_v11, %v1148_v3  ;;  %v1160_v19 = vadd.f32 %v1159_v12, %v1068_v4 }
 0x32c   :  { %v1145_v20 = vrot.slane %v1144_v14, 1  ;;  %v1155_v21 = vrot.slane %v1154_v17, 2  ;;  %v1266_v16 = vsel %vm1265_vm5, %v1134_v31, %v1264_v9 }
 0x32d   :  { %v1151_v22 = vrot.slane %v1150_v18, 1  ;;  %v1161_v24 = vrot.slane %v1160_v19, 2  ;;  %v1275_v25 = vsel %vm1265_vm5, %v1140_v15, %v1274_v13 }
 0x32e   :  { %v1146_v26 = vadd.f32 %v1145_v20, %v1144_v14  ;;  %v1156_v27 = vadd.f32 %v1155_v21, %v1154_v17 }
 0x32f   :  { %v1152_v28 = vadd.f32 %v1151_v22, %v1150_v18  ;;  %v1162_v29 = vadd.f32 %v1161_v24, %v1160_v19 }
 0x330   :  { %v1157_v30 = vrot.slane %v1156_v27, 1  ;;  %v1268_v32 = vsel %vm1267_vm6, %v1146_v26, %v1266_v16 }
 0x331   :  { %v1163_v33 = vrot.slane %v1162_v29, 1  ;;  %v1276_v34 = vsel %vm1267_vm6, %v1152_v28, %v1275_v25 }
 0x332   :  { %v1158_v36 = vadd.f32 %v1157_v30, %v1156_v27 }
 0x333   :  { %v1164_v37 = vadd.f32 %v1163_v33, %v1162_v29 }
 0x334   :  { %v1270_v38 = vsel %vm1269_vm7, %v1158_v36, %v1268_v32 }
 0x335   :  { %v1277_v35 = vsel %vm1269_vm7, %v1164_v37, %v1276_v34 }
 0x336   :  { %1344 = vmatprep.mubr.f32.mxu0 %v1277_v35 }
 0x337   :  { %1345 = vmatmul.mubr.f32.vlgmr.msra.gmra.mrb[4].mxu0 %v1270_v38 }
 0x40a   :  { %v1346_v43 = vpop.f32.mrb[4].mxu0 }
 0x40b   :  { %v1347_v44 = vadd.f32 %v1346_v43, %v1234_v41  ;;  %v1348_v45 = vpop.f32.mrb[5].mxu0 }
 0x40c   :  { %v1349_v46 = vadd.f32 %v1348_v45, %v1238_v42 }
 0x40d   :  { %1351 = vst [vmem:[%s2848_s10] sm:$0xff] %v1347_v44 }
 0x40e   :  { %1352 = vst [vmem:[%s2848_s10 + $0x8] sm:$0xff] %v1349_v46 }

</bundles_post_ra>
